<compile_context>
chip_gen: v7x
topology: tpu7x:2x2x1
jax: 0.10.0
libtpu: 0.0.40
codegen_flags: <defaults>
</compile_context>

<pallas_src>
import functools

import jax
import jax.numpy as jnp
from jax.experimental import pallas as pl
from jax.experimental.pallas import tpu as pltpu


# ---------------------------------------------------------------------------
# Per-generation VMEM budget and tiling helpers
# ---------------------------------------------------------------------------

def _vmem_limit_bytes():
    try:
        return int(pltpu.get_tpu_info().vmem_capacity_bytes * 0.85)
    except Exception:
        return 32 * 1024 * 1024


_VMEM_LIMIT = _vmem_limit_bytes()


def _round_up(n, m):
    return -(-n // m) * m


def _pick_row_tile(rows, bytes_per_row, target_bytes=4 << 20):
    """Largest divisor of `rows` (multiple of 8 unless full) fitting the target."""
    max_rows = max(8, target_bytes // max(int(bytes_per_row), 1))
    if rows <= max_rows:
        return rows
    start = int(max_rows) - int(max_rows) % 8
    for t in range(start, 7, -8):
        if rows % t == 0:
            return t
    return rows


# ---------------------------------------------------------------------------
# Kernels
# ---------------------------------------------------------------------------

def _conv3x3_relu_kernel(x_ref, w_ref, b_ref, o_ref, *, padded_w, out_rows):
    """3x3 conv + bias + ReLU on one image via 9 tap-offset MXU matmuls.

    x_ref : (1, rows_in, Cin)   zero-padded image, row-major flattened, bf16
    w_ref : (9, Cin, Cout)      tap-major weights, bf16
    b_ref : (1, Cout)           bias, f32
    o_ref : (1, out_rows, Cout) out_rows = H*(W+2); 2 junk cols per image row
    """
    cout = o_ref.shape[-1]
    acc = jnp.zeros((out_rows, cout), jnp.float32)
    for dy in range(3):
        for dx in range(3):
            off = dy * padded_w + dx                       # static sublane offset
            tap = x_ref[0, off:off + out_rows, :]          # (M, Cin) bf16 window
            acc = acc + jnp.dot(tap, w_ref[dy * 3 + dx],
                                preferred_element_type=jnp.float32)
    acc = jnp.maximum(acc + b_ref[...].astype(jnp.float32), 0.0)
    o_ref[0] = acc.astype(o_ref.dtype)


def _maxpool2x2_kernel(x_ref, o_ref, *, chans):
    """Fused 2x2/stride-2 max pool.

    x_ref : (1, tile, 2*W*C)  one output row per sublane row,
                              lanes = [even input row | odd input row]
    o_ref : (1, tile, Wo*C)   lane-dense pooled rows
    """
    x = x_ref[0]
    wc = x.shape[-1] // 2
    v = jnp.maximum(x[:, :wc], x[:, wc:])                  # vertical max  (tile, W*C)
    wo = wc // (2 * chans)
    cols = [jnp.maximum(v[:, (2 * j) * chans:(2 * j + 1) * chans],
                        v[:, (2 * j + 1) * chans:(2 * j + 2) * chans])
            for j in range(wo)]                            # horizontal max per out col
    o_ref[0] = jnp.concatenate(cols, axis=-1)


def _l1_sum_kernel(a_ref, b_ref, o_ref):
    """Accumulate sum(|a - b|) over the row-tile grid axis into a (1, 1) output."""
    @pl.when(pl.program_id(0) == 0)
    def _():
        o_ref[...] = jnp.zeros_like(o_ref)

    d = jnp.abs(a_ref[...].astype(jnp.float32) - b_ref[...].astype(jnp.float32))
    s = jnp.sum(d, axis=1, keepdims=True)   # lane reduce
    s = jnp.sum(s, axis=0, keepdims=True)   # sublane reduce
    o_ref[...] = o_ref[...] + s


# ---------------------------------------------------------------------------
# Pallas wrappers
# ---------------------------------------------------------------------------

def conv3x3_relu_pallas(x, w, b):
    """x: (B,H,W,Cin) bf16, w: (9,Cin,Cout) bf16, b: (Cout,) f32 -> (B,H,W,Cout) bf16."""
    B, H, W, Cin = x.shape
    Cout = w.shape[-1]
    Hp, Wp = H + 2, W + 2
    M = H * Wp                                # flat output rows (incl. 2 junk cols/row)
    rows_in = _round_up(Hp * Wp + 2, 8)       # covers the largest tap offset 2*Wp + 2

    xflat = jnp.pad(x, ((0, 0), (1, 1), (1, 1), (0, 0))).reshape(B, Hp * Wp, Cin)
    xflat = jnp.pad(xflat, ((0, 0), (0, rows_in - Hp * Wp), (0, 0)))

    kern = functools.partial(_conv3x3_relu_kernel, padded_w=Wp, out_rows=M)
    out = pl.pallas_call(
        kern,
        out_shape=jax.ShapeDtypeStruct((B, M, Cout), jnp.bfloat16),
        grid_spec=pltpu.PrefetchScalarGridSpec(
            num_scalar_prefetch=0,
            grid=(B,),
            in_specs=[
                pl.BlockSpec((1, rows_in, Cin), lambda n: (n, 0, 0)),
                # Weight/bias are grid-invariant: single-buffer to save VMEM.
                pl.BlockSpec((9, Cin, Cout), lambda n: (0, 0, 0),
                             pipeline_mode=pl.Buffered(1)),
                pl.BlockSpec((1, Cout), lambda n: (0, 0),
                             pipeline_mode=pl.Buffered(1)),
            ],
            out_specs=pl.BlockSpec((1, M, Cout), lambda n: (n, 0, 0)),
        ),
        compiler_params=pltpu.CompilerParams(
            dimension_semantics=("parallel",),
            vmem_limit_bytes=_VMEM_LIMIT,
        ),
    )(xflat, w, b.reshape(1, Cout))
    # Drop the 2 junk columns per image row (cheap XLA slice).
    return out.reshape(B, H, Wp, Cout)[:, :, :W, :]


def maxpool2x2_pallas(x):
    """2x2 / stride-2 max pool with in-kernel phase extraction.  x: (B,H,W,C)."""
    B, H, W, C = x.shape
    Ho, Wo = H // 2, W // 2
    lane_in, lane_out = 2 * W * C, Wo * C
    xr = x.reshape(B, Ho, lane_in)                         # free row-major reshape
    tile = _pick_row_tile(Ho, lane_in * x.dtype.itemsize)
    kern = functools.partial(_maxpool2x2_kernel, chans=C)
    out = pl.pallas_call(
        kern,
        out_shape=jax.ShapeDtypeStruct((B, Ho, lane_out), x.dtype),
        grid_spec=pltpu.PrefetchScalarGridSpec(
            num_scalar_prefetch=0,
            grid=(B, Ho // tile),
            in_specs=[pl.BlockSpec((1, tile, lane_in), lambda n, t: (n, t, 0))],
            out_specs=pl.BlockSpec((1, tile, lane_out), lambda n, t: (n, t, 0)),
        ),
        compiler_params=pltpu.CompilerParams(
            dimension_semantics=("parallel", "parallel"),
            vmem_limit_bytes=_VMEM_LIMIT,
        ),
    )(xr)
    return out.reshape(B, Ho, Wo, C)


def l1_mean_pallas(a, b):
    """mean(|a - b|) for NHWC feature maps, lane-dense blocks + resident accumulator."""
    N, H, W, C = a.shape
    R, L = N * H, W * C
    a2, b2 = a.reshape(R, L), b.reshape(R, L)              # lane-dense (>=128 lanes)
    tile = _pick_row_tile(R, 2 * L * a.dtype.itemsize)
    s = pl.pallas_call(
        _l1_sum_kernel,
        out_shape=jax.ShapeDtypeStruct((1, 1), jnp.float32),
        grid_spec=pltpu.PrefetchScalarGridSpec(
            num_scalar_prefetch=0,
            grid=(R // tile,),
            in_specs=[pl.BlockSpec((tile, L), lambda i: (i, 0)),
                      pl.BlockSpec((tile, L), lambda i: (i, 0))],
            out_specs=pl.BlockSpec((1, 1), lambda i: (0, 0)),   # resident accumulator
        ),
        compiler_params=pltpu.CompilerParams(
            dimension_semantics=("arbitrary",),
            vmem_limit_bytes=_VMEM_LIMIT,
        ),
    )(a2, b2)
    return s[0, 0] / jnp.float32(a.size)


# ---------------------------------------------------------------------------
# VGG19 feature trunk (slices 1..5) and the VGG loss
# ---------------------------------------------------------------------------

# 13 convs of torchvision VGG19 "features" up to conv5_1 (layer 28).
_VGG_CONV_CHANNELS = (
    (3, 64), (64, 64), (64, 128), (128, 128), (128, 256),
    (256, 256), (256, 256), (256, 256), (256, 512),
    (512, 512), (512, 512), (512, 512), (512, 512),
)

# Op sequence of each slice; features are tapped after each slice.
_VGG_SLICES = (
    (("conv", 0),),
    (("conv", 1), ("pool",), ("conv", 2)),
    (("conv", 3), ("pool",), ("conv", 4)),
    (("conv", 5), ("conv", 6), ("conv", 7), ("pool",), ("conv", 8)),
    (("conv", 9), ("conv", 10), ("conv", 11), ("pool",), ("conv", 12)),
)

_LOSS_WEIGHTS = (1.0 / 32, 1.0 / 16, 1.0 / 8, 1.0 / 4, 1.0)


def init_vgg19_params(key):
    """Deterministic He-init stand-in for the pretrained VGG19 weights (bf16)."""
    params = []
    for cin, cout in _VGG_CONV_CHANNELS:
        key, kw = jax.random.split(key)
        std = (2.0 / (9 * cin)) ** 0.5
        w = (jax.random.normal(kw, (9, cin, cout), jnp.float32) * std
             ).astype(jnp.bfloat16)                      # tap-major (9, Cin, Cout)
        params.append((w, jnp.zeros((cout,), jnp.float32)))
    return params


def vgg19_features(x, params, conv_fn, pool_fn):
    """x: (B, H, W, 3) NHWC -> [h_relu1, ..., h_relu5]."""
    feats = []
    h = x
    for ops in _VGG_SLICES:
        for op in ops:
            if op[0] == "conv":
                w, bvec = params[op[1]]
                h = conv_fn(h, w, bvec)
            else:
                h = pool_fn(h)
        feats.append(h)
    return feats


def vgg_loss_pallas(x, y, params):
    """x, y: (N, C, H, W) NCHW like the PyTorch module."""
    if x.shape[1] == 1:
        x = jnp.tile(x, (1, 3, 1, 1))
    if y.shape[1] == 1:
        y = jnp.tile(y, (1, 3, 1, 1))
    n = x.shape[0]
    xy = jnp.concatenate([x, y], axis=0)                     # run the trunk once on 2N
    xy = jnp.transpose(xy, (0, 2, 3, 1)).astype(jnp.bfloat16)  # NCHW -> NHWC, bf16

    feats = vgg19_features(xy, params, conv3x3_relu_pallas, maxpool2x2_pallas)

    loss = jnp.float32(0.0)
    for wgt, f in zip(_LOSS_WEIGHTS, feats):
        # .detach() in the PyTorch module only affects gradients; forward value
        # is identical.
        loss = loss + jnp.float32(wgt) * l1_mean_pallas(f[:n], f[n:])
    return loss


# ---------------------------------------------------------------------------
# Pure-JAX reference (same bf16-compute / f32-accumulate semantics, XLA only)
# ---------------------------------------------------------------------------

def _conv3x3_relu_ref(x, w, b):
    cin, cout = x.shape[-1], w.shape[-1]
    y = jax.lax.conv_general_dilated(
        x, w.reshape(3, 3, cin, cout), (1, 1), "SAME",
        dimension_numbers=("NHWC", "HWIO", "NHWC"),
        preferred_element_type=jnp.float32)
    return jnp.maximum(y + b.astype(jnp.float32), 0.0).astype(jnp.bfloat16)


def _maxpool2x2_ref(x):
    return jnp.maximum(
        jnp.maximum(x[:, 0::2, 0::2, :], x[:, 0::2, 1::2, :]),
        jnp.maximum(x[:, 1::2, 0::2, :], x[:, 1::2, 1::2, :]))


def vgg_loss_ref(x, y, params):
    if x.shape[1] == 1:
        x = jnp.tile(x, (1, 3, 1, 1))
    if y.shape[1] == 1:
        y = jnp.tile(y, (1, 3, 1, 1))
    x = jnp.transpose(x, (0, 2, 3, 1)).astype(jnp.bfloat16)
    y = jnp.transpose(y, (0, 2, 3, 1)).astype(jnp.bfloat16)
    fx = vgg19_features(x, params, _conv3x3_relu_ref, _maxpool2x2_ref)
    fy = vgg19_features(y, params, _conv3x3_relu_ref, _maxpool2x2_ref)
    loss = jnp.float32(0.0)
    for wgt, a, b in zip(_LOSS_WEIGHTS, fx, fy):
        loss = loss + jnp.float32(wgt) * jnp.mean(
            jnp.abs(a.astype(jnp.float32) - b.astype(jnp.float32)))
    return loss


# ---------------------------------------------------------------------------
# Self-test
# ---------------------------------------------------------------------------

if __name__ == "__main__":
    key = jax.random.PRNGKey(0)
    kx, ky, kp = jax.random.split(key, 3)

    # Small shapes: batch=2, 1 channel (exercises the repeat-to-3 path), 16x16
    # spatial (four 2x2 pools -> 16 -> 8 -> 4 -> 2 -> 1).
    N, C, H, W = 2, 1, 16, 16
    x = jax.random.normal(kx, (N, C, H, W), dtype=jnp.float32)
    y = jax.random.normal(ky, (N, C, H, W), dtype=jnp.float32)
    params = init_vgg19_params(kp)

    loss = jax.block_until_ready(vgg_loss_pallas(x, y, params))
    ref = jax.block_until_ready(vgg_loss_ref(x, y, params))

    assert bool(jnp.isfinite(loss)), "non-finite loss from Pallas path"
    assert bool(jnp.allclose(loss, ref, rtol=5e-2, atol=1e-3)), (
        "mismatch vs reference", float(loss), float(ref))

    print("KERNEL_OK")
</pallas_src>

<mosaic_0001>
module attributes {stable_mosaic.version = 11 : i64} {
  func.func @_conv3x3_relu_kernel(%arg0: i32, %arg1: memref<1x328x3xbf16, #tpu.memory_space<vmem>>, %arg2: memref<9x3x64xbf16, #tpu.memory_space<vmem>>, %arg3: memref<1x64xf32, #tpu.memory_space<vmem>>, %arg4: memref<1x288x64xbf16, #tpu.memory_space<vmem>>) attributes {dimension_semantics = [#tpu.dimension_semantics<parallel>], iteration_bounds = array<i64: 4>, scalar_prefetch = 0 : i64, scratch_operands = 0 : i64, tpu.core_type = #tpu.core_type<tc>, window_params = [{transform_indices = @transform_0, window_bounds = array<i64: 1, 328, 3>}, {pipeline_mode = #tpu.pipeline_mode<synchronous>, transform_indices = @transform_1, window_bounds = array<i64: 9, 3, 64>}, {pipeline_mode = #tpu.pipeline_mode<synchronous>, transform_indices = @transform_2, window_bounds = array<i64: 1, 64>}, {transform_indices = @transform_3, window_bounds = array<i64: 1, 288, 64>}]} {
    %cst = arith.constant 0.000000e+00 : f32
    %0 = vector.broadcast %cst : f32 to vector<288x64xf32>
    %c0 = arith.constant 0 : index
    %c0_0 = arith.constant 0 : index
    %c0_1 = arith.constant 0 : index
    %1 = vector.load %arg1[%c0, %c0_0, %c0_1] : memref<1x328x3xbf16, #tpu.memory_space<vmem>>, vector<1x288x3xbf16>
    %2 = vector.shape_cast %1 : vector<1x288x3xbf16> to vector<288x3xbf16>
    %c0_2 = arith.constant 0 : index
    %c0_3 = arith.constant 0 : index
    %c0_4 = arith.constant 0 : index
    %3 = vector.load %arg2[%c0_2, %c0_3, %c0_4] : memref<9x3x64xbf16, #tpu.memory_space<vmem>>, vector<1x3x64xbf16>
    %4 = vector.shape_cast %3 : vector<1x3x64xbf16> to vector<3x64xbf16>
    %cst_5 = arith.constant dense<0.000000e+00> : vector<288x64xf32>
    %5 = tpu.matmul %2, %4, %cst_5 {dimension_numbers = #tpu.dot_dimension_numbers<[1], [0], [0], [1], [0, 0, 1, 1], [], []>} : vector<288x3xbf16>, vector<3x64xbf16>, vector<288x64xf32> -> vector<288x64xf32>
    %6 = arith.addf %0, %5 : vector<288x64xf32>
    %c0_6 = arith.constant 0 : index
    %c1 = arith.constant 1 : index
    %c0_7 = arith.constant 0 : index
    %7 = vector.load %arg1[%c0_6, %c1, %c0_7] : memref<1x328x3xbf16, #tpu.memory_space<vmem>>, vector<1x288x3xbf16>
    %8 = vector.shape_cast %7 : vector<1x288x3xbf16> to vector<288x3xbf16>
    %c1_8 = arith.constant 1 : index
    %c0_9 = arith.constant 0 : index
    %c0_10 = arith.constant 0 : index
    %9 = vector.load %arg2[%c1_8, %c0_9, %c0_10] : memref<9x3x64xbf16, #tpu.memory_space<vmem>>, vector<1x3x64xbf16>
    %10 = vector.shape_cast %9 : vector<1x3x64xbf16> to vector<3x64xbf16>
    %cst_11 = arith.constant dense<0.000000e+00> : vector<288x64xf32>
    %11 = tpu.matmul %8, %10, %cst_11 {dimension_numbers = #tpu.dot_dimension_numbers<[1], [0], [0], [1], [0, 0, 1, 1], [], []>} : vector<288x3xbf16>, vector<3x64xbf16>, vector<288x64xf32> -> vector<288x64xf32>
    %12 = arith.addf %6, %11 : vector<288x64xf32>
    %c0_12 = arith.constant 0 : index
    %c2 = arith.constant 2 : index
    %c0_13 = arith.constant 0 : index
    %13 = vector.load %arg1[%c0_12, %c2, %c0_13] : memref<1x328x3xbf16, #tpu.memory_space<vmem>>, vector<1x288x3xbf16>
    %14 = vector.shape_cast %13 : vector<1x288x3xbf16> to vector<288x3xbf16>
    %c2_14 = arith.constant 2 : index
    %c0_15 = arith.constant 0 : index
    %c0_16 = arith.constant 0 : index
    %15 = vector.load %arg2[%c2_14, %c0_15, %c0_16] : memref<9x3x64xbf16, #tpu.memory_space<vmem>>, vector<1x3x64xbf16>
    %16 = vector.shape_cast %15 : vector<1x3x64xbf16> to vector<3x64xbf16>
    %cst_17 = arith.constant dense<0.000000e+00> : vector<288x64xf32>
    %17 = tpu.matmul %14, %16, %cst_17 {dimension_numbers = #tpu.dot_dimension_numbers<[1], [0], [0], [1], [0, 0, 1, 1], [], []>} : vector<288x3xbf16>, vector<3x64xbf16>, vector<288x64xf32> -> vector<288x64xf32>
    %18 = arith.addf %12, %17 : vector<288x64xf32>
    %c0_18 = arith.constant 0 : index
    %c18 = arith.constant 18 : index
    %c0_19 = arith.constant 0 : index
    %19 = vector.load %arg1[%c0_18, %c18, %c0_19] : memref<1x328x3xbf16, #tpu.memory_space<vmem>>, vector<1x288x3xbf16>
    %20 = vector.shape_cast %19 : vector<1x288x3xbf16> to vector<288x3xbf16>
    %c3 = arith.constant 3 : index
    %c0_20 = arith.constant 0 : index
    %c0_21 = arith.constant 0 : index
    %21 = vector.load %arg2[%c3, %c0_20, %c0_21] : memref<9x3x64xbf16, #tpu.memory_space<vmem>>, vector<1x3x64xbf16>
    %22 = vector.shape_cast %21 : vector<1x3x64xbf16> to vector<3x64xbf16>
    %cst_22 = arith.constant dense<0.000000e+00> : vector<288x64xf32>
    %23 = tpu.matmul %20, %22, %cst_22 {dimension_numbers = #tpu.dot_dimension_numbers<[1], [0], [0], [1], [0, 0, 1, 1], [], []>} : vector<288x3xbf16>, vector<3x64xbf16>, vector<288x64xf32> -> vector<288x64xf32>
    %24 = arith.addf %18, %23 : vector<288x64xf32>
    %c0_23 = arith.constant 0 : index
    %c19 = arith.constant 19 : index
    %c0_24 = arith.constant 0 : index
    %25 = vector.load %arg1[%c0_23, %c19, %c0_24] : memref<1x328x3xbf16, #tpu.memory_space<vmem>>, vector<1x288x3xbf16>
    %26 = vector.shape_cast %25 : vector<1x288x3xbf16> to vector<288x3xbf16>
    %c4 = arith.constant 4 : index
    %c0_25 = arith.constant 0 : index
    %c0_26 = arith.constant 0 : index
    %27 = vector.load %arg2[%c4, %c0_25, %c0_26] : memref<9x3x64xbf16, #tpu.memory_space<vmem>>, vector<1x3x64xbf16>
    %28 = vector.shape_cast %27 : vector<1x3x64xbf16> to vector<3x64xbf16>
    %cst_27 = arith.constant dense<0.000000e+00> : vector<288x64xf32>
    %29 = tpu.matmul %26, %28, %cst_27 {dimension_numbers = #tpu.dot_dimension_numbers<[1], [0], [0], [1], [0, 0, 1, 1], [], []>} : vector<288x3xbf16>, vector<3x64xbf16>, vector<288x64xf32> -> vector<288x64xf32>
    %30 = arith.addf %24, %29 : vector<288x64xf32>
    %c0_28 = arith.constant 0 : index
    %c20 = arith.constant 20 : index
    %c0_29 = arith.constant 0 : index
    %31 = vector.load %arg1[%c0_28, %c20, %c0_29] : memref<1x328x3xbf16, #tpu.memory_space<vmem>>, vector<1x288x3xbf16>
    %32 = vector.shape_cast %31 : vector<1x288x3xbf16> to vector<288x3xbf16>
    %c5 = arith.constant 5 : index
    %c0_30 = arith.constant 0 : index
    %c0_31 = arith.constant 0 : index
    %33 = vector.load %arg2[%c5, %c0_30, %c0_31] : memref<9x3x64xbf16, #tpu.memory_space<vmem>>, vector<1x3x64xbf16>
    %34 = vector.shape_cast %33 : vector<1x3x64xbf16> to vector<3x64xbf16>
    %cst_32 = arith.constant dense<0.000000e+00> : vector<288x64xf32>
    %35 = tpu.matmul %32, %34, %cst_32 {dimension_numbers = #tpu.dot_dimension_numbers<[1], [0], [0], [1], [0, 0, 1, 1], [], []>} : vector<288x3xbf16>, vector<3x64xbf16>, vector<288x64xf32> -> vector<288x64xf32>
    %36 = arith.addf %30, %35 : vector<288x64xf32>
    %c0_33 = arith.constant 0 : index
    %c36 = arith.constant 36 : index
    %c0_34 = arith.constant 0 : index
    %37 = vector.load %arg1[%c0_33, %c36, %c0_34] : memref<1x328x3xbf16, #tpu.memory_space<vmem>>, vector<1x288x3xbf16>
    %38 = vector.shape_cast %37 : vector<1x288x3xbf16> to vector<288x3xbf16>
    %c6 = arith.constant 6 : index
    %c0_35 = arith.constant 0 : index
    %c0_36 = arith.constant 0 : index
    %39 = vector.load %arg2[%c6, %c0_35, %c0_36] : memref<9x3x64xbf16, #tpu.memory_space<vmem>>, vector<1x3x64xbf16>
    %40 = vector.shape_cast %39 : vector<1x3x64xbf16> to vector<3x64xbf16>
    %cst_37 = arith.constant dense<0.000000e+00> : vector<288x64xf32>
    %41 = tpu.matmul %38, %40, %cst_37 {dimension_numbers = #tpu.dot_dimension_numbers<[1], [0], [0], [1], [0, 0, 1, 1], [], []>} : vector<288x3xbf16>, vector<3x64xbf16>, vector<288x64xf32> -> vector<288x64xf32>
    %42 = arith.addf %36, %41 : vector<288x64xf32>
    %c0_38 = arith.constant 0 : index
    %c37 = arith.constant 37 : index
    %c0_39 = arith.constant 0 : index
    %43 = vector.load %arg1[%c0_38, %c37, %c0_39] : memref<1x328x3xbf16, #tpu.memory_space<vmem>>, vector<1x288x3xbf16>
    %44 = vector.shape_cast %43 : vector<1x288x3xbf16> to vector<288x3xbf16>
    %c7 = arith.constant 7 : index
    %c0_40 = arith.constant 0 : index
    %c0_41 = arith.constant 0 : index
    %45 = vector.load %arg2[%c7, %c0_40, %c0_41] : memref<9x3x64xbf16, #tpu.memory_space<vmem>>, vector<1x3x64xbf16>
    %46 = vector.shape_cast %45 : vector<1x3x64xbf16> to vector<3x64xbf16>
    %cst_42 = arith.constant dense<0.000000e+00> : vector<288x64xf32>
    %47 = tpu.matmul %44, %46, %cst_42 {dimension_numbers = #tpu.dot_dimension_numbers<[1], [0], [0], [1], [0, 0, 1, 1], [], []>} : vector<288x3xbf16>, vector<3x64xbf16>, vector<288x64xf32> -> vector<288x64xf32>
    %48 = arith.addf %42, %47 : vector<288x64xf32>
    %c0_43 = arith.constant 0 : index
    %c38 = arith.constant 38 : index
    %c0_44 = arith.constant 0 : index
    %49 = vector.load %arg1[%c0_43, %c38, %c0_44] : memref<1x328x3xbf16, #tpu.memory_space<vmem>>, vector<1x288x3xbf16>
    %50 = vector.shape_cast %49 : vector<1x288x3xbf16> to vector<288x3xbf16>
    %c8 = arith.constant 8 : index
    %c0_45 = arith.constant 0 : index
    %c0_46 = arith.constant 0 : index
    %51 = vector.load %arg2[%c8, %c0_45, %c0_46] : memref<9x3x64xbf16, #tpu.memory_space<vmem>>, vector<1x3x64xbf16>
    %52 = vector.shape_cast %51 : vector<1x3x64xbf16> to vector<3x64xbf16>
    %cst_47 = arith.constant dense<0.000000e+00> : vector<288x64xf32>
    %53 = tpu.matmul %50, %52, %cst_47 {dimension_numbers = #tpu.dot_dimension_numbers<[1], [0], [0], [1], [0, 0, 1, 1], [], []>} : vector<288x3xbf16>, vector<3x64xbf16>, vector<288x64xf32> -> vector<288x64xf32>
    %54 = arith.addf %48, %53 : vector<288x64xf32>
    %c0_48 = arith.constant 0 : index
    %c0_49 = arith.constant 0 : index
    %55 = vector.load %arg3[%c0_48, %c0_49] : memref<1x64xf32, #tpu.memory_space<vmem>>, vector<1x64xf32>
    %56 = vector.broadcast %55 : vector<1x64xf32> to vector<288x64xf32>
    %57 = arith.addf %54, %56 : vector<288x64xf32>
    %cst_50 = arith.constant 0.000000e+00 : f32
    %58 = vector.broadcast %cst_50 : f32 to vector<288x64xf32>
    %59 = arith.maximumf %57, %58 : vector<288x64xf32>
    %60 = arith.truncf %59 : vector<288x64xf32> to vector<288x64xbf16>
    %c0_51 = arith.constant 0 : index
    %c0_52 = arith.constant 0 : index
    %c0_53 = arith.constant 0 : index
    %61 = vector.load %arg4[%c0_51, %c0_52, %c0_53] : memref<1x288x64xbf16, #tpu.memory_space<vmem>>, vector<1x288x64xbf16>
    %62 = vector.shape_cast %61 : vector<1x288x64xbf16> to vector<288x64xbf16>
    %63 = vector.shape_cast %60 : vector<288x64xbf16> to vector<1x288x64xbf16>
    tpu.vector_store %arg4[%c0_51, %c0_52, %c0_53], %63 {strides = array<i32>} : memref<1x288x64xbf16, #tpu.memory_space<vmem>>, vector<1x288x64xbf16>,
    return
  }
  func.func @transform_0(%arg0: i32) -> (i32, i32, i32) {
    %c0_i32 = arith.constant 0 : i32
    %c0_i32_0 = arith.constant 0 : i32
    %c0_i32_1 = arith.constant 0 : i32
    return %arg0, %c0_i32, %c0_i32_0 : i32, i32, i32
  }
  func.func @transform_1(%arg0: i32) -> (i32, i32, i32) {
    %c0_i32 = arith.constant 0 : i32
    %c0_i32_0 = arith.constant 0 : i32
    %c0_i32_1 = arith.constant 0 : i32
    %c0_i32_2 = arith.constant 0 : i32
    return %c0_i32, %c0_i32_0, %c0_i32_1 : i32, i32, i32
  }
  func.func @transform_2(%arg0: i32) -> (i32, i32) {
    %c0_i32 = arith.constant 0 : i32
    %c0_i32_0 = arith.constant 0 : i32
    %c0_i32_1 = arith.constant 0 : i32
    return %c0_i32, %c0_i32_0 : i32, i32
  }
  func.func @transform_3(%arg0: i32) -> (i32, i32, i32) {
    %c0_i32 = arith.constant 0 : i32
    %c0_i32_0 = arith.constant 0 : i32
    %c0_i32_1 = arith.constant 0 : i32
    return %arg0, %c0_i32, %c0_i32_0 : i32, i32, i32
  }
}

</mosaic_0001>

<bundles_post_ra>
// kernel: tpu_custom_call.1
= control target key start
LH: loop header
LB: loop body
LE: loop exit
PB: predicated region body
PF: predicated region fallthrough
CT: control target
= control target key end

     0   :  { %s5167_s12 = smov 0   ;;  %s6132_s0 = inlined_call_operand.vmem [shape: bf16[4,328,3], index: 0, kind: input, shape index: {}]   ;;  %s6133_s1 = inlined_call_operand.vmem [shape: bf16[9,3,64], index: 1, kind: input, shape index: {}]   ;;  %s6134_s2 = inlined_call_operand.vmem [shape: f32[1,64], index: 2, kind: input, shape index: {}]   ;;  %s6135_s3 = inlined_call_operand.vmem [shape: bf16[4,288,64], index: 3, kind: output, shape index: {}]  }
   0x1 LB: > { %s3938_s13 = sadd.s32 4294967295, %s5144_s12   ;;  %p3942_p0 = scmp.ge.s32.totalorder %s5144_s12, 1  ;;  %s5144_s12 = sphi %s5167_s12, %s13_s12  }
   0x2   : > { %p137_p1 = scmp.lt.s32.totalorder %s5144_s12, 5 }
   0x4   : > { %p138_p2 = pnand %p3942_p0, %p137_p1 }
   0x5   : > { %vm509_vm0 = vcmask (!%p138_p2), 1040384   ;;  %vm510_vm1 = vcmask (!%p138_p2), 1041408   ;;  %v4059_v0 = vld [vmem:[%s6133_s1 + $0x8] sm:$0x3] (!%p138_p2)  ;;  %p161_p3 = scmp.lt.s32.totalorder (!%p138_p2), %s3938_s13, 3  ;;  %v5146_v1 = vmov (!%p138_p2), 65535  }
   0x6   : > { %141 = sbr.rel (%p138_p2) target bundleno = 575 (0x23f), region = 32  ;;  %v511_v2 = vsel (!%p138_p2), %vm509_vm0, 4294967295, %v5146_v1  ;;  %v3945_v3 = vld [vmem:[%s6133_s1 + $0x2] sm:$0x3] (!%p138_p2)  ;;  %v4079_v5 = vld [vmem:[%s6133_s1 + $0xa] sm:$0x3] (!%p138_p2) }
   0x7   : > { %v5181_v4 = vsel (!%p138_p2), %vm510_vm1, %v511_v2, 0  ;;  %v208_v9 = vld [vmem:[%s6133_s1] sm:$0x3] (!%p138_p2)  ;;  %vm305_vm2 = vsmask.f32 (!%p138_p2), 7424  ;;  %vm454_vm3 = vcmask (!%p138_p2), 23552  }
   0x8   : > { %v5189_v6 = vand.u32 (!%p138_p2), %v4059_v0, %v5181_v4  ;;  %v514_v7 = vand.u32 (!%p138_p2), %v3945_v3, %v5181_v4  ;;  %v5193_v8 = vand.u32 (!%p138_p2), %v4079_v5, %v5181_v4  ;;  %v5200_v10 = vand.u32 (!%p138_p2), %v5181_v4, %v208_v9  ;;  %v4099_v11 = vld [vmem:[%s6133_s1 + $0xc] sm:$0x3] (!%p138_p2)  ;;  %v4001_v17 = vld [vmem:[%s6133_s1 + $0x4] sm:$0x3] (!%p138_p2) }
   0x9   : > { %vm1668_vm4 = vsmask.f32 (!%p138_p2), 6400  ;;  %v5245_v26 = vand.u32 (!%p138_p2), %v4099_v11, %v5181_v4  ;;  %v5256_v35 = vand.u32 (!%p138_p2), %v4001_v17, %v5181_v4  ;;  %vm2115_vm5 = vcmask (!%p138_p2), 1045504  }
   0xa   : > { %4575 = vmatprep.subr.bf16.mxu0 (!%p138_p2), %v5189_v6  ;;  %4423 = vmatprep.subr.bf16.mxu1 (!%p138_p2), %v514_v7  ;;  %vm915_vm6 = vcmask (!%p138_p2), 1046528   ;;  %vm2868_vm7 = vsmask.f32 (!%p138_p2), 5376  ;;  %vm3315_vm8 = vcmask (!%p138_p2), 1044480   ;;  %vm3846_vm9 = vcmask (!%p138_p2), 519168  }
   0xb   : > { %4576 = vmatpush3.bf16.msra.mxu0 (!%p138_p2), %v5189_v6  ;;  %4424 = vmatpush3.bf16.msra.mxu1 (!%p138_p2), %v514_v7 }
   0xc   : > { %4613 = vmatprep.subr.bf16.mxu0 (!%p138_p2), %v5193_v8  ;;  %4461 = vmatprep.subr.bf16.mxu1 (!%p138_p2), %v5200_v10 }
   0xd   : > { %s6137_s13 = smov (!%p161_p3, %s3938_s13), 3 }
   0xe   : > { %s5055_s22 = smul.u32 164, %s6137_s13 }
   0xf   : > { %s5056_s11 = smul.u32 144, %s6137_s13 }
  0x10   : > { %s5207_s25 = scalar_lea.vmem %s6132_s0, %s5055_s22 }
  0x11   : > { %v172_v12 = vld [vmem:[%s5207_s25] sm:$0xf]  ;;  %v5214_v13 = vld [vmem:[%s5207_s25 + $0x4] sm:$0xf]  ;;  %v5222_v15 = vld [vmem:[%s5207_s25 + $0x8] sm:$0xff]   ;;  %s6011_s16 = scalar_lea.vmem %s6135_s3, %s5056_s11 }
  0x12   : > { %v5219_v14 = vcombine.low %v172_v12, %v5214_v13  ;;  %v1223_v16 = vld [vmem:[%s5207_s25 + $0x8] sm:$0xe]  ;;  %v5229_v18 = vld [vmem:[%s5207_s25 + $0xc] sm:$0xf]  ;;  %v314_v21 = vshll.u32 %v5222_v15, 16  ;;  %v318_v22 = vshrl.u32 %v5222_v15, 16 }
  0x13   : > { %v5236_v23 = vld [vmem:[%s5207_s25 + $0x10] sm:$0xff]   ;;  %v5242_v25 = vcombine.low %v1223_v16, %v5229_v18  ;;  %v5253_v34 = vld [vmem:[%s5207_s25 + $0x18] sm:$0xff]   ;;  %v5262_v41 = vld [vmem:[%s5207_s25 + $0x20] sm:$0xff]  }
  0x14   : > { %v307_v19 = vshrl.u32 %v5219_v14, 16  ;;  %v309_v20 = vshll.u32 %v5219_v14, 16  ;;  %v5239_v24 = vld [vmem:[%s5207_s25 + $0x10] sm:$0xff]   ;;  %v316_v28 = vrot.slane %v314_v21, 1  ;;  %v1678_v29 = vshrl.u32 %v5236_v23, 16  ;;  %v5259_v40 = vld [vmem:[%s5207_s25 + $0x18] sm:$0xff]  }
  0x15   : > { %v1681_v30 = vshll.u32 %v5236_v23, 16  ;;  %v1670_v31 = vshrl.u32 %v5242_v25, 16  ;;  %v1673_v32 = vshll.u32 %v5242_v25, 16  ;;  %v322_v33 = vshll.u32 %v5239_v24, 16  ;;  %v5272_v54 = vld [vmem:[%s5207_s25 + $0x20] sm:$0xff]   ;;  %v5275_v55 = vld [vmem:[%s5207_s25 + $0x28] sm:$0xff]  }
  0x16   : > { %v311_v27 = vrot.slane %v309_v20, 1  ;;  %v320_v37 = vor.u32 %v318_v22, %v316_v28  ;;  %v1680_v38 = vrot.slane %v1678_v29, 1  ;;  %v1687_v45 = vshrl.u32 %v5253_v34, 16  ;;  %v5281_v60 = vld [vmem:[%s5207_s25 + $0x28] sm:$0xff]   ;;  %v5288_v1 = vld [vmem:[%s5207_s25 + $0x30] sm:$0xff]  }
  0x17   : > { %v1683_v39 = vrot.slane %v1681_v30, 2  ;;  %v1672_v42 = vrot.slane %v1670_v31, 1  ;;  %v1675_v43 = vrot.slane %v1673_v32, 2  ;;  %v324_v44 = vrot.slane %v322_v33, 1  ;;  %v5293_v9 = vld [vmem:[%s5207_s25 + $0x30] sm:$0xff]   ;;  %v5306_v30 = vld [vmem:[%s5207_s25 + $0x38] sm:$0xff]  }
  0x18   : > { %v312_v36 = vor.u32 %v311_v27, %v307_v19  ;;  %v1690_v48 = vshll.u32 %v5253_v34, 16  ;;  %v326_v49 = vshrl.u32 %v5239_v24, 16  ;;  %v1689_v52 = vrot.slane %v1687_v45, 1 }
  0x19   : > { %v1684_v47 = vor.u32 %v1683_v39, %v1680_v38  ;;  %v1676_v50 = vor.u32 %v1675_v43, %v1672_v42  ;;  %v325_v51 = vsel %vm305_vm2, %v320_v37, %v324_v44  ;;  %v330_v53 = vshll.u32 %v5259_v40, 16  ;;  %v5315_v43 = vld [vmem:[%s5207_s25 + $0x38] sm:$0xff]  }
  0x1a   : > { %v317_v46 = vsel %vm305_vm2, %v312_v36, %v316_v28  ;;  %v1692_v56 = vrot.slane %v1690_v48, 2  ;;  %v328_v57 = vor.u32 %v326_v49, %v324_v44  ;;  %v1696_v58 = vshrl.u32 %v5262_v41, 16 }
  0x1b   : > { %4425 = vmatprep.mubr.msk.bf16.mxu1 %vm454_vm3, %v317_v46  ;;  %v1699_v59 = vshll.u32 %v5262_v41, 16  ;;  %v1685_v61 = vsel %vm1668_vm4, %v1676_v50, %v1684_v47  ;;  %v332_v62 = vrot.slane %v330_v53, 1  ;;  %v334_v63 = vshrl.u32 %v5259_v40, 16 }
  0x1c   : > { %4426 = vmatmul.mubr.msk.bf16.vlgmr.msra.gmra.mrb[0].mxu1 %vm454_vm3, %v325_v51  ;;  %v338_v0 = vshll.u32 %v5272_v54, 16  ;;  %4577 = vmatprep.mubr.msk.bf16.mxu0 %vm454_vm3, %v1685_v61  ;;  %v1693_v2 = vor.u32 %v1692_v56, %v1689_v52  ;;  %v1698_v3 = vrot.slane %v1696_v58, 1  ;;  %v1705_v7 = vshrl.u32 %v5275_v55, 16  ;;  %v5325_v51 = vld [vmem:[%s5207_s25 + $0x40] sm:$0xff]  }
  0x1d   : > { %4462 = vmatpush3.bf16.msra.mxu1 %v5200_v10  ;;  %v1701_v5 = vrot.slane %v1699_v59, 2  ;;  %v333_v11 = vsel %vm305_vm2, %v328_v57, %v332_v62  ;;  %v336_v12 = vor.u32 %v334_v63, %v332_v62  ;;  %v1708_v10 = vshll.u32 %v5275_v55, 16  ;;  %v5330_v58 = vld [vmem:[%s5207_s25 + $0x40] sm:$0xff]  }
  0x1e   : > { %4499 = vmatprep.subr.bf16.mxu1 %v5256_v35  ;;  %v340_v16 = vrot.slane %v338_v0, 1  ;;  %v1694_v17 = vsel %vm1668_vm4, %v1684_v47, %v1693_v2  ;;  %4429 = vmatprep.mubr.msk.bf16.mxu1 %vm454_vm3, %v333_v11  ;;  %v1707_v20 = vrot.slane %v1705_v7, 1  ;;  %v342_v21 = vshrl.u32 %v5272_v54, 16  ;;  %v5338_v7 = vld [vmem:[%s5207_s25 + $0x48] sm:$0xff]  }
  0x1f   : > { %v1702_v19 = vor.u32 %v1701_v5, %v1698_v3  ;;  %4578 = vmatmul.mubr.msk.bf16.vlgmr.msra.gmra.mrb[0].mxu0 %vm454_vm3, %v1694_v17  ;;  %v1710_v27 = vrot.slane %v1708_v10, 2  ;;  %v346_v28 = vshll.u32 %v5281_v60, 16  ;;  %v1714_v29 = vshrl.u32 %v5288_v1, 16  ;;  %v5341_v11 = vld [vmem:[%s5207_s25 + $0x48] sm:$0xff]  }
  0x20   : > { %v341_v22 = vsel %vm305_vm2, %v336_v12, %v340_v16  ;;  %4614 = vmatpush3.bf16.msra.mxu0 %v5193_v8  ;;  %v344_v32 = vor.u32 %v342_v21, %v340_v16  ;;  %v1717_v33 = vshll.u32 %v5288_v1, 16  ;;  %v350_v36 = vshrl.u32 %v5281_v60, 16  ;;  %v5350_v21 = vld [vmem:[%s5207_s25 + $0x50] sm:$0xff]  }
  0x21   : > { %v1703_v31 = vsel %vm1668_vm4, %v1693_v2, %v1702_v19  ;;  %v1711_v37 = vor.u32 %v1710_v27, %v1707_v20  ;;  %v348_v38 = vrot.slane %v346_v28, 1  ;;  %v1716_v39 = vrot.slane %v1714_v29, 1  ;;  %4651 = vmatprep.subr.bf16.mxu0 %v5245_v26 }
  0x22   : > { %4581 = vmatprep.mubr.msk.bf16.mxu0 %vm454_vm3, %v1703_v31  ;;  %v354_v42 = vshll.u32 %v5293_v9, 16  ;;  %v1719_v8 = vrot.slane %v1717_v33, 2  ;;  %v1723_v44 = vshrl.u32 %v5306_v30, 16  ;;  %v1726_v45 = vshll.u32 %v5306_v30, 16  ;;  %v5358_v33 = vld [vmem:[%s5207_s25 + $0x50] sm:$0xff]  }
  0x23   : > { %v358_v46 = vshrl.u32 %v5293_v9, 16  ;;  %v1712_v47 = vsel %vm1668_vm4, %v1702_v19, %v1711_v37  ;;  %v349_v48 = vsel %vm305_vm2, %v344_v32, %v348_v38  ;;  %v352_v49 = vor.u32 %v350_v36, %v348_v38  ;;  %v5363_v38 = vld [vmem:[%s5207_s25 + $0x58] sm:$0xff]  }
  0x24   : > { %4430 = vmatmul.mubr.msk.bf16.gmra.mrb[4].mxu1 %vm454_vm3, %v341_v22  ;;  %v356_v50 = vrot.slane %v354_v42, 1  ;;  %v1720_v52 = vor.u32 %v1719_v8, %v1716_v39  ;;  %v1725_v53 = vrot.slane %v1723_v44, 1  ;;  %v1728_v56 = vrot.slane %v1726_v45, 2 }
  0x25   : > { %4433 = vmatprep.mubr.msk.bf16.mxu1 %vm454_vm3, %v349_v48  ;;  %v362_v57 = vshll.u32 %v5315_v43, 16  ;;  %v1732_v62 = vshrl.u32 %v5325_v51, 16  ;;  %v1735_v63 = vshll.u32 %v5325_v51, 16  ;;  %v366_v5 = vshrl.u32 %v5315_v43, 16 }
  0x26   : > { %v357_v59 = vsel %vm305_vm2, %v352_v49, %v356_v50  ;;  %v360_v61 = vor.u32 %v358_v46, %v356_v50  ;;  %v1721_v0 = vsel %vm1668_vm4, %v1711_v37, %v1720_v52  ;;  %v1729_v2 = vor.u32 %v1728_v56, %v1725_v53  ;;  %v5368_v49 = vld [vmem:[%s5207_s25 + $0x58] sm:$0xff]  }
  0x27   : > { %v364_v3 = vrot.slane %v362_v57, 1  ;;  %4582 = vmatmul.mubr.msk.bf16.gmra.mrb[4].mxu0 %vm454_vm3, %v1712_v47  ;;  %v1734_v12 = vrot.slane %v1732_v62, 1  ;;  %v1737_v16 = vrot.slane %v1735_v63, 2  ;;  %v370_v10 = vshll.u32 %v5330_v58, 16 }
  0x28   : > { %v374_v17 = vshrl.u32 %v5330_v58, 16  ;;  %4585 = vmatprep.mubr.msk.bf16.mxu0 %vm454_vm3, %v1721_v0  ;;  %v1741_v20 = vshrl.u32 %v5338_v7, 16  ;;  %v1744_v27 = vshll.u32 %v5338_v7, 16  ;;  %v378_v28 = vshll.u32 %v5341_v11, 16 }
  0x29   : > { %v365_v19 = vsel %vm305_vm2, %v360_v61, %v364_v3  ;;  %v1738_v22 = vor.u32 %v1737_v16, %v1734_v12  ;;  %v372_v29 = vrot.slane %v370_v10, 1  ;;  %v1750_v31 = vshrl.u32 %v5350_v21, 16 }
  0x2a   : > { %v1753_v32 = vshll.u32 %v5350_v21, 16  ;;  %v1730_v36 = vsel %vm1668_vm4, %v1720_v52, %v1729_v2  ;;  %v368_v37 = vor.u32 %v366_v5, %v364_v3  ;;  %v1743_v39 = vrot.slane %v1741_v20, 1  ;;  %v5382_v3 = vld [vmem:[%s5207_s25 + $0x60] sm:$0xff]   ;;  %v5387_v20 = vld [vmem:[%s5207_s25 + $0x68] sm:$0xff]  }
  0x2b   : > { %v1746_v42 = vrot.slane %v1744_v27, 2  ;;  %v376_v8 = vor.u32 %v374_v17, %v372_v29  ;;  %v380_v44 = vrot.slane %v378_v28, 1  ;;  %v1739_v45 = vsel %vm1668_vm4, %v1729_v2, %v1738_v22  ;;  %v2109_v2 = vld [vmem:[%s5207_s25 + $0x8] sm:$0xc] }
  0x2c   : > { %4434 = vmatmul.mubr.msk.bf16.gmra.mrb[8].mxu1 %vm454_vm3, %v357_v59  ;;  %v1752_v46 = vrot.slane %v1750_v31, 1  ;;  %v1755_v47 = vrot.slane %v1753_v32, 2  ;;  %v386_v48 = vshll.u32 %v5358_v33, 16  ;;  %v373_v50 = vsel %vm305_vm2, %v368_v37, %v372_v29 }
  0x2d   : > { %4437 = vmatprep.mubr.msk.bf16.mxu1 %vm454_vm3, %v365_v19  ;;  %v382_v52 = vshrl.u32 %v5341_v11, 16  ;;  %v1759_v53 = vshrl.u32 %v5363_v38, 16  ;;  %v1762_v56 = vshll.u32 %v5363_v38, 16  ;;  %v1747_v57 = vor.u32 %v1746_v42, %v1743_v39 }
  0x2e   : > { %v381_v59 = vsel %vm305_vm2, %v376_v8, %v380_v44  ;;  %v390_v61 = vshrl.u32 %v5358_v33, 16  ;;  %v394_v62 = vshll.u32 %v5368_v49, 16  ;;  %v1756_v63 = vor.u32 %v1755_v47, %v1752_v46 }
  0x2f   : > { %4586 = vmatmul.mubr.msk.bf16.gmra.mrb[8].mxu0 %vm454_vm3, %v1730_v36  ;;  %v388_v0 = vrot.slane %v386_v48, 1  ;;  %v384_v5 = vor.u32 %v382_v52, %v380_v44  ;;  %v1761_v12 = vrot.slane %v1759_v53, 1  ;;  %v1764_v16 = vrot.slane %v1762_v56, 2  ;;  %v5404_v44 = vld [vmem:[%s5207_s25 + $0x70] sm:$0xff]  }
  0x30   : > { %4589 = vmatprep.mubr.msk.bf16.mxu0 %vm454_vm3, %v1739_v45  ;;  %v1748_v10 = vsel %vm1668_vm4, %v1738_v22, %v1747_v57  ;;  %v396_v19 = vrot.slane %v394_v62, 1  ;;  %v1757_v27 = vsel %vm1668_vm4, %v1747_v57, %v1756_v63  ;;  %v4080_v28 = vcombine.low %v2109_v2, %v5229_v18  ;;  %v5425_v2 = vld [vmem:[%s5207_s25 + $0x80] sm:$0xff]  }
  0x31   : > { %v392_v17 = vor.u32 %v390_v61, %v388_v0  ;;  %v402_v29 = vshll.u32 %v5382_v3, 16  ;;  %v389_v31 = vsel %vm305_vm2, %v384_v5, %v388_v0  ;;  %v398_v32 = vshrl.u32 %v5368_v49, 16 }
  0x32   : > { %v5396_v22 = vor.u32 %v1764_v16, %v1761_v12  ;;  %v406_v37 = vshrl.u32 %v5382_v3, 16  ;;  %v410_v39 = vshll.u32 %v5387_v20, 16  ;;  %v2116_v18 = vrot.slane %v4080_v28, 2 }
  0x33   : > { %v397_v36 = vsel %vm305_vm2, %v392_v17, %v396_v19  ;;  %v2117_v42 = vrot.slane %v5236_v23, 2  ;;  %v404_v8 = vrot.slane %v402_v29, 1  ;;  %v400_v45 = vor.u32 %v398_v32, %v396_v19  ;;  %v5433_v17 = vld [vmem:[%s5207_s25 + $0x88] sm:$0xff]  }
  0x34   : > { %4438 = vmatmul.mubr.msk.bf16.gmra.mrb[12].mxu1 %vm454_vm3, %v373_v50  ;;  %v1766_v46 = vsel %vm1668_vm4, %v1756_v63, %v5396_v22  ;;  %v412_v48 = vrot.slane %v410_v39, 1  ;;  %v5410_v50 = vld [vmem:[%s5207_s25 + $0x78] sm:$0xff]   ;;  %v418_v23 = vshll.u32 %v5404_v44, 16  ;;  %v2119_v56 = vrot.slane %v5253_v34, 2  ;;  %v4137_v34 = vld [vmem:[%s6133_s1 + $0xe] sm:$0x3] }
  0x35   : > { %4441 = vmatprep.mubr.msk.bf16.mxu1 %vm454_vm3, %v381_v59  ;;  %v408_v47 = vor.u32 %v406_v37, %v404_v8  ;;  %v2118_v52 = vsel %vm2115_vm5, %v2116_v18, %v2117_v42  ;;  %v405_v53 = vsel %vm305_vm2, %v400_v45, %v404_v8  ;;  %v414_v57 = vshrl.u32 %v5387_v20, 16 }
  0x36   : > { %v422_v61 = vshrl.u32 %v5404_v44, 16  ;;  %v426_v62 = vshll.u32 %v5410_v50, 16  ;;  %v2121_v63 = vrot.slane %v5262_v41, 2  ;;  %v420_v0 = vrot.slane %v418_v23, 1 }
  0x37   : > { %4590 = vmatmul.mubr.msk.bf16.gmra.mrb[12].mxu0 %vm454_vm3, %v1748_v10  ;;  %v413_v59 = vsel %vm305_vm2, %v408_v47, %v412_v48  ;;  %v416_v5 = vor.u32 %v414_v57, %v412_v48  ;;  %v2120_v12 = vsel %vm2115_vm5, %v2117_v42, %v2119_v56  ;;  %v5437_v19 = vand.u32 %v4137_v34, %v5181_v4  ;;  %v5454_v42 = vld [vmem:[%s5207_s25 + $0x90] ss:$0 sps:$4 sm:$0x11]   ;;  %v5481_v34 = vld [vmem:[%s5207_s25 + $0x60] sm:$0xff]  }
  0x38   : > { %4593 = vmatprep.mubr.msk.bf16.mxu0 %vm454_vm3, %v1757_v27  ;;  %v424_v16 = vor.u32 %v422_v61, %v420_v0  ;;  %v428_v10 = vrot.slane %v426_v62, 1  ;;  %v2122_v41 = vsel %vm2115_vm5, %v2119_v56, %v2121_v63  ;;  %v434_v27 = vshll.u32 %v5425_v2, 16 }
  0x39   : > { %v421_v28 = vsel %vm305_vm2, %v416_v5, %v420_v0  ;;  %v2123_v29 = vrot.slane %v5275_v55, 2  ;;  %v442_v37 = vshll.u32 %v5433_v17, 16  ;;  %v2125_v39 = vrot.slane %v5288_v1, 2  ;;  %v4021_v5 = vld [vmem:[%s6133_s1 + $0x6] sm:$0x3] }
  0x3a   : > { %v429_v32 = vsel %vm305_vm2, %v424_v16, %v428_v10  ;;  %v436_v18 = vrot.slane %v434_v27, 1  ;;  %v446_v47 = vshrl.u32 %v5433_v17, 16  ;;  %v450_v48 = vshll.u32 %v5454_v42, 16  ;;  %v5500_v16 = vld [vmem:[%s5207_s25 + $0x68] sm:$0xff]  }
  0x3b   : > { %v444_v45 = vrot.slane %v442_v37, 1 }
  0x3c   : > { %4442 = vmatmul.mubr.msk.bf16.gmra.mrb[16].mxu1 %vm454_vm3, %v389_v31  ;;  %v430_v31 = vshrl.u32 %v5410_v50, 16  ;;  %v452_v57 = vrot.slane %v450_v48, 1 }
  0x3d   : > { %4445 = vmatprep.mubr.msk.bf16.mxu1 %vm454_vm3, %v397_v36  ;;  %v438_v36 = vshrl.u32 %v5425_v2, 16  ;;  %v448_v56 = vor.u32 %v446_v47, %v444_v45  ;;  %v5553_v47 = vld [vmem:[%s5207_s25 + $0x98] ss:$0 sps:$4 sm:$0x33]  }
  0x3e   : > { %v432_v55 = vor.u32 %v430_v31, %v428_v10  ;;  %v5505_v10 = vld [vmem:[%s5207_s25 + $0x70] sm:$0xff]   ;;  %v5521_v31 = vld [vmem:[%s5207_s25 + $0x80] sm:$0xff]  }
  0x3f   : > { %4594 = vmatmul.mubr.msk.bf16.gmra.mrb[16].mxu0 %vm454_vm3, %v1766_v46  ;;  %v440_v8 = vor.u32 %v438_v36, %v436_v18  ;;  %v2126_v46 = vsel %vm2115_vm5, %v2123_v29, %v2125_v39  ;;  %v453_v62 = vsel %vm305_vm2, %v448_v56, %v452_v57  ;;  %v2141_v27 = vrot.slane %v5505_v10, 2 }
  0x40   : > { %4615 = vmatprep.mubr.msk.bf16.mxu0 %vm454_vm3, %v2118_v52  ;;  %v437_v1 = vsel %vm305_vm2, %v432_v55, %v436_v18  ;;  %v2127_v52 = vrot.slane %v5306_v30, 2  ;;  %v2131_v30 = vrot.slane %v5338_v7, 2  ;;  %v2135_v7 = vrot.slane %v5363_v38, 2  ;;  %v5537_v55 = vld [vmem:[%s5207_s25 + $0x90] sm:$0xff]  }
  0x41   : > { %v445_v23 = vsel %vm305_vm2, %v440_v8, %v444_v45  ;;  %v2145_v36 = vrot.slane %v5521_v31, 2  ;;  %v2149_v8 = vrot.slane %v5537_v55, 2  ;;  %v2423_v45 = vld [vmem:[%s5207_s25 + $0x10] sm:$0xc] }
  0x44   : > { %4446 = vmatmul.mubr.msk.bf16.gmra.mrb[20].mxu1 %vm454_vm3, %v405_v53  ;;  %v2129_v53 = vrot.slane %v5325_v51, 2  ;;  %v2133_v51 = vrot.slane %v5350_v21, 2  ;;  %v5490_v21 = vand.u32 %v4021_v5, %v5181_v4 }
  0x45   : > { %4449 = vmatprep.mubr.msk.bf16.mxu1 %vm454_vm3, %v413_v59  ;;  %v2128_v59 = vsel %vm2115_vm5, %v2125_v39, %v2127_v52  ;;  %v5533_v39 = vld [vmem:[%s5207_s25 + $0x88] sm:$0xff]  }
  0x46   : > { %v2130_v61 = vsel %vm2115_vm5, %v2127_v52, %v2129_v53  ;;  %v2134_v0 = vsel %vm2115_vm5, %v2131_v30, %v2133_v51 }
  0x47   : > { %4616 = vmatmul.mubr.msk.bf16.vlgmr.msra.gmra.mrb[0].mxu0 %vm454_vm3, %v2120_v12  ;;  %v2136_v12 = vsel %vm2115_vm5, %v2133_v51, %v2135_v7 }
  0x48   : > { %4652 = vmatpush3.bf16.msra.mxu0 %v5245_v26  ;;  %4619 = vmatprep.mubr.msk.bf16.mxu0 %vm454_vm3, %v2122_v41  ;;  %v2124_v26 = vsel %vm2115_vm5, %v2121_v63, %v2123_v29  ;;  %v2132_v63 = vsel %vm2115_vm5, %v2129_v53, %v2131_v30  ;;  %v2139_v41 = vrot.slane %v5500_v16, 2  ;;  %v2151_v53 = vrot.slane %v5553_v47, 2  ;;  %v5577_v30 = vld [vmem:[%s5207_s25 + $0x28] sm:$0xff]  }
  0x49   : > { %4689 = vmatprep.subr.bf16.mxu0 %v5437_v19 }
  0x4a   : > { %v2142_v29 = vsel %vm2115_vm5, %v2139_v41, %v2141_v27 }
  0x4c   : > { %4450 = vmatmul.mubr.msk.bf16.gmra.mrb[24].mxu1 %vm454_vm3, %v421_v28  ;;  %v5517_v28 = vld [vmem:[%s5207_s25 + $0x78] sm:$0xff]  }
  0x4d   : > { %4453 = vmatprep.mubr.msk.bf16.mxu1 %vm454_vm3, %v429_v32  ;;  %v2143_v32 = vrot.slane %v5517_v28, 2 }
  0x4f   : > { %4620 = vmatmul.mubr.msk.bf16.gmra.mrb[4].mxu0 %vm454_vm3, %v2124_v26  ;;  %v2144_v37 = vsel %vm2115_vm5, %v2141_v27, %v2143_v32  ;;  %v2146_v18 = vsel %vm2115_vm5, %v2143_v32, %v2145_v36  ;;  %v2147_v26 = vrot.slane %v5533_v39, 2  ;;  %v909_v32 = vld [vmem:[%s5207_s25] sm:$0xe] }
  0x50   : > { %4623 = vmatprep.mubr.msk.bf16.mxu0 %vm454_vm3, %v2126_v46  ;;  %v5547_v46 = vld [vmem:[%s5207_s25 + $0x14] sm:$0xf] }
  0x51   : > { %v2150_v48 = vsel %vm2115_vm5, %v2147_v26, %v2149_v8  ;;  %v5557_v52 = vcombine.low %v2423_v45, %v5547_v46 }
  0x53   : > { %v2555_v56 = vrot.slane %v5557_v52, 2 }
  0x54   : > { %4454 = vmatmul.mubr.msk.bf16.gmra.mrb[28].mxu1 %vm454_vm3, %v437_v1  ;;  %v2148_v1 = vsel %vm2115_vm5, %v2145_v36, %v2147_v26 }
  0x55   : > { %4457 = vmatprep.mubr.msk.bf16.mxu1 %vm454_vm3, %v445_v23  ;;  %v5560_v23 = vld [vmem:[%s5207_s25 + $0x18] sm:$0xff]  }
  0x56   : > { %v2556_v57 = vrot.slane %v5560_v23, 2 }
  0x57   : > { %4624 = vmatmul.mubr.msk.bf16.gmra.mrb[8].mxu0 %vm454_vm3, %v2128_v59  ;;  %v2152_v59 = vsel %vm2115_vm5, %v2149_v8, %v2151_v53  ;;  %v5631_v8 = vld [vmem:[%s5207_s25 + $0x50] sm:$0xff]  }
  0x58   : > { %4627 = vmatprep.mubr.msk.bf16.mxu0 %vm454_vm3, %v2130_v61  ;;  %v5573_v61 = vld [vmem:[%s5207_s25 + $0x20] sm:$0xff]   ;;  %v2570_v53 = vrot.slane %v5631_v8, 2 }
  0x59   : > { %v2558_v51 = vrot.slane %v5573_v61, 2 }
  0x5b   : > { %v2559_v5 = vsel %vm2115_vm5, %v2556_v57, %v2558_v51 }
  0x5c   : > { %4458 = vmatmul.mubr.msk.bf16.gmra.mrb[32].mxu1 %vm454_vm3, %v453_v62  ;;  %v2557_v62 = vsel %vm2115_vm5, %v2555_v56, %v2556_v57 }
  0x5d   : > { %4463 = vmatprep.mubr.msk.bf16.mxu1 %vm454_vm3, %v5219_v14  ;;  %v2137_v14 = vrot.slane %v5481_v34, 2 }
  0x5f   : > { %4628 = vmatmul.mubr.msk.bf16.gmra.mrb[12].mxu0 %vm454_vm3, %v2132_v63  ;;  %v2138_v38 = vsel %vm2115_vm5, %v2135_v7, %v2137_v14  ;;  %v2560_v63 = vrot.slane %v5577_v30, 2  ;;  %v5592_v7 = vld [vmem:[%s5207_s25 + $0x30] sm:$0xff]  }
  0x60   : > { %4631 = vmatprep.mubr.msk.bf16.mxu0 %vm454_vm3, %v2134_v0  ;;  %v4157_v0 = vld [vmem:[%s6133_s1 + $0x10] sm:$0x3] }
  0x64   : > { %4464 = vmatmul.mubr.msk.bf16.vlgmr.msra.gmra.mrb[0].mxu1 %vm454_vm3, %v5222_v15 }
  0x65   : > { %4467 = vmatprep.mubr.msk.bf16.mxu1 %vm454_vm3, %v5239_v24  ;;  %4500 = vmatpush3.bf16.msra.mxu1 %v5256_v35  ;;  %v2140_v35 = vsel %vm2115_vm5, %v2137_v14, %v2139_v41  ;;  %v2561_v14 = vsel %vm2115_vm5, %v2558_v51, %v2560_v63  ;;  %v2562_v41 = vrot.slane %v5592_v7, 2  ;;  %v921_v51 = vrot.slane %v5259_v40, 1 }
  0x66   : > { %4537 = vmatprep.subr.bf16.mxu1 %v5490_v21 }
  0x67   : > { %4632 = vmatmul.mubr.msk.bf16.gmra.mrb[16].mxu0 %vm454_vm3, %v2136_v12  ;;  %v5596_v12 = vld [vmem:[%s5207_s25 + $0x38] sm:$0xff]  }
  0x68   : > { %4635 = vmatprep.mubr.msk.bf16.mxu0 %vm454_vm3, %v2138_v38  ;;  %v5599_v38 = vand.u32 %v4157_v0, %v5181_v4  ;;  %v2564_v27 = vrot.slane %v5596_v12, 2  ;;  %v2563_v4 = vsel %vm2115_vm5, %v2560_v63, %v2562_v41  ;;  %v5654_v0 = vld [vmem:[%s5207_s25 + $0x68] sm:$0xff]  }
  0x6c   : > { %4468 = vmatmul.mubr.msk.bf16.gmra.mrb[4].mxu1 %vm454_vm3, %v5259_v40  ;;  %v923_v40 = vrot.slane %v5272_v54, 1 }
  0x6d   : > { %4471 = vmatprep.mubr.msk.bf16.mxu1 %vm454_vm3, %v5272_v54 }
  0x6e   : > { %v924_v54 = vsel %vm915_vm6, %v921_v51, %v923_v40 }
  0x6f   : > { %4636 = vmatmul.mubr.msk.bf16.gmra.mrb[20].mxu0 %vm454_vm3, %v2140_v35  ;;  %v5613_v35 = vld [vmem:[%s5207_s25 + $0x40] sm:$0xff]  }
  0x70   : > { %4639 = vmatprep.mubr.msk.bf16.mxu0 %vm454_vm3, %v2142_v29  ;;  %v5617_v29 = vld [vmem:[%s5207_s25 + $0x48] sm:$0xff]   ;;  %v2566_v36 = vrot.slane %v5613_v35, 2 }
  0x72   : > { %v2567_v26 = vsel %vm2115_vm5, %v2564_v27, %v2566_v36 }
  0x74   : > { %4472 = vmatmul.mubr.msk.bf16.gmra.mrb[8].mxu1 %vm454_vm3, %v5281_v60 }
  0x75   : > { %4475 = vmatprep.mubr.msk.bf16.mxu1 %vm454_vm3, %v5293_v9 }
  0x77   : > { %4640 = vmatmul.mubr.msk.bf16.gmra.mrb[24].mxu0 %vm454_vm3, %v2144_v37  ;;  %v4002_v37 = vcombine.low %v909_v32, %v5214_v13  ;;  %v5636_v13 = vld [vmem:[%s5207_s25 + $0x58] sm:$0xff]  }
  0x78   : > { %4643 = vmatprep.mubr.msk.bf16.mxu0 %vm454_vm3, %v2146_v18  ;;  %v2568_v18 = vrot.slane %v5617_v29, 2  ;;  %v2572_v57 = vrot.slane %v5636_v13, 2 }
  0x79   : > { %v916_v45 = vrot.slane %v4002_v37, 1 }
  0x7a   : > { %v2573_v63 = vsel %vm2115_vm5, %v2570_v53, %v2572_v57 }
  0x7c   : > { %4476 = vmatmul.mubr.msk.bf16.gmra.mrb[12].mxu1 %vm454_vm3, %v5315_v43 }
  0x7d   : > { %4479 = vmatprep.mubr.msk.bf16.mxu1 %vm454_vm3, %v5330_v58 }
  0x7f   : > { %4644 = vmatmul.mubr.msk.bf16.gmra.mrb[28].mxu0 %vm454_vm3, %v2148_v1  ;;  %v917_v1 = vrot.slane %v5222_v15, 1  ;;  %v919_v15 = vrot.slane %v5239_v24, 1 }
  0x80   : > { %4647 = vmatprep.mubr.msk.bf16.mxu0 %vm454_vm3, %v2150_v48  ;;  %v2569_v48 = vsel %vm2115_vm5, %v2566_v36, %v2568_v18  ;;  %v5674_v36 = vld [vmem:[%s5207_s25 + $0x78] sm:$0xff]  }
  0x81   : > { %v918_v56 = vsel %vm915_vm6, %v916_v45, %v917_v1  ;;  %v5687_v45 = vld [vmem:[%s5207_s25 + $0x80] sm:$0xff]  }
  0x84   : > { %4480 = vmatmul.mubr.msk.bf16.gmra.mrb[16].mxu1 %vm454_vm3, %v5341_v11 }
  0x85   : > { %4483 = vmatprep.mubr.msk.bf16.mxu1 %vm454_vm3, %v5358_v33 }
  0x87   : > { %4648 = vmatmul.mubr.msk.bf16.gmra.mrb[32].mxu0 %vm454_vm3, %v2152_v59  ;;  %v2571_v59 = vsel %vm2115_vm5, %v2568_v18, %v2570_v53  ;;  %v2580_v18 = vrot.slane %v5674_v36, 2  ;;  %v5692_v53 = vld [vmem:[%s5207_s25 + $0x88] sm:$0xff]  }
  0x88   : > { %4653 = vmatprep.mubr.msk.bf16.mxu0 %vm454_vm3, %v2557_v62  ;;  %v5649_v62 = vld [vmem:[%s5207_s25 + $0x60] sm:$0xff]  }
  0x89   : > { %v2574_v24 = vrot.slane %v5649_v62, 2 }
  0x8c   : > { %4484 = vmatmul.mubr.msk.bf16.gmra.mrb[20].mxu1 %vm454_vm3, %v5368_v49 }
  0x8d   : > { %4487 = vmatprep.mubr.msk.bf16.mxu1 %vm454_vm3, %v5382_v3 }
  0x8f   : > { %4654 = vmatmul.mubr.msk.bf16.vlgmr.msra.gmra.mrb[0].mxu0 %vm454_vm3, %v2559_v5  ;;  %v920_v5 = vsel %vm915_vm6, %v917_v1, %v919_v15  ;;  %v929_v1 = vrot.slane %v5315_v43, 1  ;;  %v931_v43 = vrot.slane %v5330_v58, 1 }
  0x90   : > { %4690 = vmatpush3.bf16.msra.mxu0 %v5437_v19  ;;  %4657 = vmatprep.mubr.msk.bf16.mxu0 %vm454_vm3, %v2561_v14  ;;  %v2565_v19 = vsel %vm2115_vm5, %v2562_v41, %v2564_v27  ;;  %v922_v14 = vsel %vm915_vm6, %v919_v15, %v921_v51  ;;  %v2576_v41 = vrot.slane %v5654_v0, 2  ;;  %v2575_v27 = vsel %vm2115_vm5, %v2572_v57, %v2574_v24  ;;  %v5705_v51 = vld [vmem:[%s5207_s25 + $0x90] sm:$0xff]  }
  0x91   : > { %4727 = vmatprep.subr.bf16.mxu0 %v5599_v38  ;;  %v2584_v15 = vrot.slane %v5692_v53, 2 }
  0x92   : > { %v2577_v32 = vsel %vm2115_vm5, %v2574_v24, %v2576_v41 }
  0x94   : > { %4488 = vmatmul.mubr.msk.bf16.gmra.mrb[24].mxu1 %vm454_vm3, %v5387_v20 }
  0x95   : > { %4491 = vmatprep.mubr.msk.bf16.mxu1 %vm454_vm3, %v5404_v44 }
  0x97   : > { %4658 = vmatmul.mubr.msk.bf16.gmra.mrb[4].mxu0 %vm454_vm3, %v2563_v4  ;;  %v5668_v4 = vld [vmem:[%s5207_s25 + $0x70] sm:$0xff]  }
  0x98   : > { %4661 = vmatprep.mubr.msk.bf16.mxu0 %vm454_vm3, %v2565_v19  ;;  %v925_v19 = vrot.slane %v5281_v60, 1  ;;  %v927_v60 = vrot.slane %v5293_v9, 1  ;;  %v2582_v9 = vrot.slane %v5687_v45, 2 }
  0x9a   : > { %v926_v37 = vsel %vm915_vm6, %v923_v40, %v925_v19  ;;  %v930_v57 = vsel %vm915_vm6, %v927_v60, %v929_v1  ;;  %v2585_v24 = vsel %vm2115_vm5, %v2582_v9, %v2584_v15 }
  0x9c   : > { %4492 = vmatmul.mubr.msk.bf16.gmra.mrb[28].mxu1 %vm454_vm3, %v5410_v50 }
  0x9d   : > { %4495 = vmatprep.mubr.msk.bf16.mxu1 %vm454_vm3, %v5425_v2 }
  0x9f   : > { %4662 = vmatmul.mubr.msk.bf16.gmra.mrb[8].mxu0 %vm454_vm3, %v2567_v26 }
  0xa0   : > { %4665 = vmatprep.mubr.msk.bf16.mxu0 %vm454_vm3, %v2569_v48 }
  0xa4   : > { %4496 = vmatmul.mubr.msk.bf16.gmra.mrb[32].mxu1 %vm454_vm3, %v5433_v17 }
  0xa5   : > { %4501 = vmatprep.mubr.msk.bf16.mxu1 %vm454_vm3, %v918_v56  ;;  %v928_v56 = vsel %vm915_vm6, %v925_v19, %v927_v60  ;;  %v2878_v19 = vshrl.u32 %v5560_v23, 16  ;;  %v937_v60 = vrot.slane %v5368_v49, 1  ;;  %v2896_v49 = vshrl.u32 %v5577_v30, 16 }
  0xa7   : > { %4666 = vmatmul.mubr.msk.bf16.gmra.mrb[12].mxu0 %vm454_vm3, %v2571_v59  ;;  %v2583_v59 = vsel %vm2115_vm5, %v2580_v18, %v2582_v9 }
  0xa8   : > { %4669 = vmatprep.mubr.msk.bf16.mxu0 %vm454_vm3, %v2573_v63  ;;  %v933_v63 = vrot.slane %v5341_v11, 1  ;;  %v2873_v11 = vshll.u32 %v5557_v52, 16 }
  0xaa   : > { %v934_v58 = vsel %vm915_vm6, %v931_v43, %v933_v63 }
  0xac   : > { %4502 = vmatmul.mubr.msk.bf16.vlgmr.msra.gmra.mrb[0].mxu1 %vm454_vm3, %v920_v5  ;;  %v5709_v5 = vld [vmem:[%s5207_s25 + $0x98] sm:$0xff]  }
  0xad   : > { %4505 = vmatprep.mubr.msk.bf16.mxu1 %vm454_vm3, %v922_v14  ;;  %4538 = vmatpush3.bf16.msra.mxu1 %v5490_v21  ;;  %v2578_v21 = vrot.slane %v5668_v4, 2  ;;  %v932_v14 = vsel %vm915_vm6, %v929_v1, %v931_v43  ;;  %v2588_v40 = vrot.slane %v5709_v5, 2  ;;  %v2875_v1 = vrot.slane %v2873_v11, 3 }
  0xae   : > { %4765 = vmatprep.subr.bf16.mxu1 %v5189_v6 }
  0xaf   : > { %4670 = vmatmul.mubr.msk.bf16.gmra.mrb[16].mxu0 %vm454_vm3, %v2575_v27  ;;  %v2579_v26 = vsel %vm2115_vm5, %v2576_v41, %v2578_v21  ;;  %v2581_v48 = vsel %vm2115_vm5, %v2578_v21, %v2580_v18  ;;  %v2586_v41 = vrot.slane %v5705_v51, 2  ;;  %v2870_v27 = vshrl.u32 %v5557_v52, 16  ;;  %v5124_v18 = vld [vmem:[%s5207_s25 + $0xa0] ss:$0 sps:$4 sm:$0x33]  }
  0xb0   : > { %4673 = vmatprep.mubr.msk.bf16.mxu0 %vm454_vm3, %v2577_v32  ;;  %v2881_v32 = vshll.u32 %v5560_v23, 16  ;;  %v2880_v52 = vrot.slane %v2878_v19, 2  ;;  %v2590_v9 = vrot.slane %v5124_v18, 2  ;;  %v2898_v19 = vrot.slane %v2896_v49, 2 }
  0xb1   : > { %v2587_v21 = vsel %vm2115_vm5, %v2584_v15, %v2586_v41  ;;  %v2890_v15 = vshll.u32 %v5573_v61, 16  ;;  %v2926_v49 = vshll.u32 %v5613_v35, 16 }
  0xb4   : > { %4506 = vmatmul.mubr.msk.bf16.gmra.mrb[4].mxu1 %vm454_vm3, %v924_v54  ;;  %v935_v54 = vrot.slane %v5358_v33, 1 }
  0xb5   : > { %4509 = vmatprep.mubr.msk.bf16.mxu1 %vm454_vm3, %v926_v37  ;;  %v2589_v37 = vsel %vm2115_vm5, %v2586_v41, %v2588_v40 }
  0xb6   : > { %v938_v33 = vsel %vm915_vm6, %v935_v54, %v937_v60 }
  0xb7   : > { %4674 = vmatmul.mubr.msk.bf16.gmra.mrb[20].mxu0 %vm454_vm3, %v2579_v26  ;;  %v2872_v26 = vrot.slane %v2870_v27, 2  ;;  %v941_v27 = vrot.slane %v5387_v20, 1  ;;  %v2914_v20 = vshrl.u32 %v5596_v12, 16 }
  0xb8   : > { %4677 = vmatprep.mubr.msk.bf16.mxu0 %vm454_vm3, %v2581_v48  ;;  %v2883_v48 = vrot.slane %v2881_v32, 3 }
  0xb9   : > { %v2876_v43 = vor.u32 %v2875_v1, %v2872_v26  ;;  %v2917_v26 = vshll.u32 %v5596_v12, 16 }
  0xbc   : > { %4510 = vmatmul.mubr.msk.bf16.gmra.mrb[8].mxu1 %vm454_vm3, %v928_v56  ;;  %v936_v56 = vsel %vm915_vm6, %v933_v63, %v935_v54  ;;  %v939_v63 = vrot.slane %v5382_v3, 1  ;;  %v2905_v3 = vshrl.u32 %v5592_v7, 16 }
  0xbd   : > { %4513 = vmatprep.mubr.msk.bf16.mxu1 %vm454_vm3, %v930_v57  ;;  %v2887_v57 = vshrl.u32 %v5573_v61, 16 }
  0xbe   : > { %v940_v54 = vsel %vm915_vm6, %v937_v60, %v939_v63  ;;  %v943_v60 = vrot.slane %v5404_v44, 1 }
  0xbf   : > { %4678 = vmatmul.mubr.msk.bf16.gmra.mrb[24].mxu0 %vm454_vm3, %v2583_v59  ;;  %v2884_v59 = vor.u32 %v2883_v48, %v2880_v52  ;;  %v2889_v41 = vrot.slane %v2887_v57, 2  ;;  %v2907_v52 = vrot.slane %v2905_v3, 2  ;;  %v2919_v57 = vrot.slane %v2917_v26, 3 }
  0xc0   : > { %4681 = vmatprep.mubr.msk.bf16.mxu0 %vm454_vm3, %v2585_v24  ;;  %v2899_v24 = vshll.u32 %v5577_v30, 16  ;;  %v2944_v3 = vshll.u32 %v5631_v8, 16 }
  0xc1   : > { %v2885_v11 = vsel %vm2868_vm7, %v2876_v43, %v2884_v59 }
  0xc2   : > { %v2901_v32 = vrot.slane %v2899_v24, 3  ;;  %v2932_v24 = vshrl.u32 %v5617_v29, 16 }
  0xc4   : > { %4514 = vmatmul.mubr.msk.bf16.gmra.mrb[12].mxu1 %vm454_vm3, %v932_v14  ;;  %v2591_v14 = vsel %vm2115_vm5, %v2588_v40, %v2590_v9  ;;  %v2908_v40 = vshll.u32 %v5592_v7, 16  ;;  %v2902_v18 = vor.u32 %v2901_v32, %v2898_v19  ;;  %v2934_v19 = vrot.slane %v2932_v24, 2  ;;  %v5129_v24 = vld [vmem:[%s5207_s25 + $0x18] sm:$0xff]  }
  0xc5   : > { %4517 = vmatprep.mubr.msk.bf16.mxu1 %vm454_vm3, %v934_v58  ;;  %v2892_v58 = vrot.slane %v2890_v15, 3  ;;  %v944_v15 = vsel %vm915_vm6, %v941_v27, %v943_v60 }
  0xc6   : > { %v2910_v48 = vrot.slane %v2908_v40, 3 }
  0xc7   : > { %4682 = vmatmul.mubr.msk.bf16.gmra.mrb[28].mxu0 %vm454_vm3, %v2587_v21  ;;  %v2893_v21 = vor.u32 %v2892_v58, %v2889_v41  ;;  %v2928_v58 = vrot.slane %v2926_v49, 3  ;;  %v2968_v49 = vshrl.u32 %v5654_v0, 16 }
  0xc8   : > { %4685 = vmatprep.mubr.msk.bf16.mxu0 %vm454_vm3, %v2589_v37  ;;  %v942_v37 = vsel %vm915_vm6, %v939_v63, %v941_v27  ;;  %v2911_v43 = vor.u32 %v2910_v48, %v2907_v52  ;;  %v2935_v63 = vshll.u32 %v5617_v29, 16  ;;  %v949_v27 = vrot.slane %v5433_v17, 1  ;;  %v5128_v48 = vld [vmem:[%s5207_s25 + $0x10] sm:$0xff]  }
  0xc9   : > { %v2894_v1 = vsel %vm2868_vm7, %v2884_v59, %v2893_v21  ;;  %v2903_v9 = vsel %vm2868_vm7, %v2893_v21, %v2902_v18  ;;  %v2923_v59 = vshrl.u32 %v5613_v35, 16  ;;  %v2941_v21 = vshrl.u32 %v5631_v8, 16 }
  0xca   : > { %v2937_v32 = vrot.slane %v2935_v63, 3  ;;  %v2950_v17 = vshrl.u32 %v5636_v13, 16  ;;  %v1355_v52 = vrot.slane %v5242_v25, 1  ;;  %v2962_v25 = vshll.u32 %v5649_v62, 16 }
  0xcb   : > { %v2925_v41 = vrot.slane %v2923_v59, 2  ;;  %v2943_v26 = vrot.slane %v2941_v21, 2  ;;  %v1358_v63 = vrot.slane %v5129_v24, 1 }
  0xcc   : > { %4518 = vmatmul.mubr.msk.bf16.gmra.mrb[16].mxu1 %vm454_vm3, %v936_v56  ;;  %v945_v56 = vrot.slane %v5410_v50, 1  ;;  %v2938_v40 = vor.u32 %v2937_v32, %v2934_v19  ;;  %v2970_v19 = vrot.slane %v2968_v49, 2  ;;  %v3007_v49 = vshll.u32 %v5692_v53, 16 }
  0xcd   : > { %4521 = vmatprep.mubr.msk.bf16.mxu1 %vm454_vm3, %v938_v33  ;;  %v2916_v33 = vrot.slane %v2914_v20, 2  ;;  %v951_v20 = vrot.slane %v5454_v42, 1 }
  0xce   : > { %v946_v44 = vsel %vm915_vm6, %v943_v60, %v945_v56 }
  0xcf   : > { %4686 = vmatmul.mubr.msk.bf16.gmra.mrb[32].mxu0 %vm454_vm3, %v2591_v14  ;;  %v2920_v50 = vor.u32 %v2919_v57, %v2916_v33  ;;  %v2912_v14 = vsel %vm2868_vm7, %v2902_v18, %v2911_v43  ;;  %v2953_v18 = vshll.u32 %v5636_v13, 16  ;;  %v2952_v33 = vrot.slane %v2950_v17, 2 }
  0xd0   : > { %4691 = vmatprep.mubr.msk.bf16.mxu0 %vm454_vm3, %v2885_v11  ;;  %v2986_v17 = vshrl.u32 %v5674_v36, 16 }
  0xd1   : > { %v2921_v11 = vsel %vm2868_vm7, %v2911_v43, %v2920_v50  ;;  %v2955_v57 = vrot.slane %v2953_v18, 3  ;;  %v2989_v18 = vshll.u32 %v5674_v36, 16 }
  0xd3   : > { %v2956_v59 = vor.u32 %v2955_v57, %v2952_v33  ;;  %v2988_v33 = vrot.slane %v2986_v17, 2  ;;  %v2991_v57 = vrot.slane %v2989_v18, 3  ;;  %v3025_v17 = vshll.u32 %v5709_v5, 16  ;;  %v5135_v18 = vld [vmem:[%s5207_s25 + $0x48] sm:$0xff]  }
  0xd4   : > { %4522 = vmatmul.mubr.msk.bf16.gmra.mrb[20].mxu1 %vm454_vm3, %v940_v54 }
  0xd5   : > { %4525 = vmatprep.mubr.msk.bf16.mxu1 %vm454_vm3, %v942_v37 }
  0xd7   : > { %4692 = vmatmul.mubr.msk.bf16.vlgmr.msra.gmra.mrb[0].mxu0 %vm454_vm3, %v2894_v1  ;;  %v2946_v1 = vrot.slane %v2944_v3, 3  ;;  %v2980_v3 = vshll.u32 %v5668_v4, 16 }
  0xd8   : > { %4728 = vmatpush3.bf16.msra.mxu0 %v5599_v38  ;;  %4695 = vmatprep.mubr.msk.bf16.mxu0 %vm454_vm3, %v2903_v9  ;;  %v947_v38 = vrot.slane %v5425_v2, 1  ;;  %v2929_v2 = vor.u32 %v2928_v58, %v2925_v41  ;;  %v2964_v41 = vrot.slane %v2962_v25, 3  ;;  %v5130_v58 = vld [vmem:[%s5207_s25 + $0x20] sm:$0xff]   ;;  %v2992_v25 = vor.u32 %v2991_v57, %v2988_v33 }
  0xd9   : > { %v2947_v42 = vor.u32 %v2946_v1, %v2943_v26  ;;  %v3027_v57 = vrot.slane %v3025_v17, 3  ;;  %v3321_v17 = vrot.slane %v5577_v30, 3  ;;  %v3323_v30 = vrot.slane %v5592_v7, 3 }
  0xda   : > { %v948_v54 = vsel %vm915_vm6, %v945_v56, %v947_v38  ;;  %v950_v37 = vsel %vm915_vm6, %v947_v38, %v949_v27  ;;  %v2930_v60 = vsel %vm2868_vm7, %v2920_v50, %v2929_v2  ;;  %v1356_v56 = vrot.slane %v5128_v48, 1  ;;  %v5132_v48 = vld [vmem:[%s5207_s25 + $0x30] sm:$0xff]  }
  0xdb   : > { %v2939_v9 = vsel %vm2868_vm7, %v2929_v2, %v2938_v40  ;;  %v2971_v50 = vshll.u32 %v5654_v0, 16  ;;  %v2948_v38 = vsel %vm2868_vm7, %v2938_v40, %v2947_v42 }
  0xdc   : > { %4526 = vmatmul.mubr.msk.bf16.gmra.mrb[24].mxu1 %vm454_vm3, %v944_v15  ;;  %v952_v15 = vsel %vm915_vm6, %v949_v27, %v951_v20  ;;  %v1357_v43 = vsel %vm915_vm6, %v1355_v52, %v1356_v56  ;;  %v1360_v27 = vrot.slane %v5130_v58, 1  ;;  %v5131_v20 = vld [vmem:[%s5207_s25 + $0x28] sm:$0xff]   ;;  %v2982_v52 = vrot.slane %v2980_v3, 3 }
  0xdd   : > { %4529 = vmatprep.mubr.msk.bf16.mxu1 %vm454_vm3, %v946_v44  ;;  %v2959_v44 = vshrl.u32 %v5649_v62, 16  ;;  %v2973_v32 = vrot.slane %v2971_v50, 3  ;;  %v1362_v26 = vrot.slane %v5131_v20, 1  ;;  %v5133_v50 = vld [vmem:[%s5207_s25 + $0x38] sm:$0xff]   ;;  %v1370_v20 = vrot.slane %v5135_v18, 1 }
  0xde   : > { %v1361_v2 = vsel %vm915_vm6, %v1358_v63, %v1360_v27  ;;  %v1366_v24 = vrot.slane %v5133_v50, 1  ;;  %v1382_v18 = vrot.slane %v5517_v28, 1 }
  0xdf   : > { %4696 = vmatmul.mubr.msk.bf16.gmra.mrb[4].mxu0 %vm454_vm3, %v2912_v14  ;;  %v2961_v14 = vrot.slane %v2959_v44, 2  ;;  %v2974_v40 = vor.u32 %v2973_v32, %v2970_v19  ;;  %v2998_v44 = vshll.u32 %v5687_v45, 16  ;;  %v3009_v19 = vrot.slane %v3007_v49, 3  ;;  %v5137_v49 = vld [vmem:[%s5207_s25 + $0x58] sm:$0xff]  }
  0xe0   : > { %4699 = vmatprep.mubr.msk.bf16.mxu0 %vm454_vm3, %v2921_v11  ;;  %v2957_v11 = vsel %vm2868_vm7, %v2947_v42, %v2956_v59  ;;  %v1374_v50 = vrot.slane %v5137_v49, 1  ;;  %v1777_v49 = vshrl.u32 %v5500_v16, 16 }
  0xe1   : > { %v2965_v21 = vor.u32 %v2964_v41, %v2961_v14  ;;  %v3000_v14 = vrot.slane %v2998_v44, 3  ;;  %v5134_v41 = vld [vmem:[%s5207_s25 + $0x40] sm:$0xff]  }
  0xe2   : > { %v1368_v58 = vrot.slane %v5134_v41, 1 }
  0xe4   : > { %4530 = vmatmul.mubr.msk.bf16.gmra.mrb[28].mxu1 %vm454_vm3, %v948_v54  ;;  %v1359_v54 = vsel %vm915_vm6, %v1356_v56, %v1358_v63  ;;  %v1364_v56 = vrot.slane %v5132_v48, 1 }
  0xe5   : > { %4533 = vmatprep.mubr.msk.bf16.mxu1 %vm454_vm3, %v950_v37  ;;  %v2977_v37 = vshrl.u32 %v5668_v4, 16 }
  0xe6   : > { %v1367_v32 = vsel %vm915_vm6, %v1364_v56, %v1366_v24 }
  0xe7   : > { %4700 = vmatmul.mubr.msk.bf16.gmra.mrb[8].mxu0 %vm454_vm3, %v2930_v60  ;;  %v2966_v60 = vsel %vm2868_vm7, %v2956_v59, %v2965_v21  ;;  %v2979_v1 = vrot.slane %v2977_v37, 2  ;;  %v3004_v59 = vshrl.u32 %v5692_v53, 16  ;;  %v3016_v37 = vshll.u32 %v5705_v51, 16 }
  0xe8   : > { %4703 = vmatprep.mubr.msk.bf16.mxu0 %vm454_vm3, %v2939_v9  ;;  %v2975_v9 = vsel %vm2868_vm7, %v2965_v21, %v2974_v40  ;;  %v1369_v21 = vsel %vm915_vm6, %v1366_v24, %v1368_v58 }
  0xe9   : > { %v2983_v42 = vor.u32 %v2982_v52, %v2979_v1  ;;  %v3018_v1 = vrot.slane %v3016_v37, 3  ;;  %v5136_v52 = vld [vmem:[%s5207_s25 + $0x50] sm:$0xff]  }
  0xea   : > { %v1372_v48 = vrot.slane %v5136_v52, 1  ;;  %v3325_v52 = vrot.slane %v5596_v12, 3 }
  0xeb   : > { %v2984_v63 = vsel %vm2868_vm7, %v2974_v40, %v2983_v42  ;;  %v3022_v40 = vshrl.u32 %v5709_v5, 16 }
  0xec   : > { %4534 = vmatmul.mubr.msk.bf16.gmra.mrb[32].mxu1 %vm454_vm3, %v952_v15  ;;  %v1363_v15 = vsel %vm915_vm6, %v1360_v27, %v1362_v26  ;;  %v2993_v27 = vsel %vm2868_vm7, %v2983_v42, %v2992_v25  ;;  %v3326_v7 = vsel %vm3315_vm8, %v3323_v30, %v3325_v52 }
  0xed   : > { %4539 = vmatprep.mubr.msk.bf16.mxu1 %vm454_vm3, %v1357_v43  ;;  %v2995_v43 = vshrl.u32 %v5687_v45, 16  ;;  %v3024_v33 = vrot.slane %v3022_v40, 2 }
  0xef   : > { %4704 = vmatmul.mubr.msk.bf16.gmra.mrb[12].mxu0 %vm454_vm3, %v2948_v38  ;;  %v2997_v38 = vrot.slane %v2995_v43, 2 }
  0xf0   : > { %4707 = vmatprep.mubr.msk.bf16.mxu0 %vm454_vm3, %v2957_v11  ;;  %v3006_v11 = vrot.slane %v3004_v59, 2  ;;  %v3309_v59 = vld [vmem:[%s5207_s25 + $0x10] sm:$0x8] }
  0xf2   : > { %v3010_v3 = vor.u32 %v3009_v19, %v3006_v11 }
  0xf4   : > { %4540 = vmatmul.mubr.msk.bf16.vlgmr.msra.gmra.mrb[0].mxu1 %vm454_vm3, %v1359_v54  ;;  %v3001_v54 = vor.u32 %v3000_v14, %v2997_v38  ;;  %v1376_v14 = vrot.slane %v5481_v34, 1 }
  0xf5   : > { %4543 = vmatprep.mubr.msk.bf16.mxu1 %vm454_vm3, %v1361_v2  ;;  %4766 = vmatpush3.bf16.msra.mxu1 %v5189_v6  ;;  %v1365_v6 = vsel %vm915_vm6, %v1362_v26, %v1364_v56  ;;  %v3013_v2 = vshrl.u32 %v5705_v51, 16  ;;  %v5844_v56 = vld [vmem:[%s5207_s25 + $0xa0] ss:$0 sps:$4 sm:$0x77]  }
  0xf6   : > { %v3002_v26 = vsel %vm2868_vm7, %v2992_v25, %v3001_v54  ;;  %v3031_v43 = vshrl.u32 %v5844_v56, 16  ;;  %v3034_v44 = vshll.u32 %v5844_v56, 16  ;;  %v3028_v25 = vor.u32 %v3027_v57, %v3024_v33 }
  0xf7   : > { %4708 = vmatmul.mubr.msk.bf16.gmra.mrb[16].mxu0 %vm454_vm3, %v2966_v60  ;;  %v3015_v60 = vrot.slane %v3013_v2, 2  ;;  %v1377_v19 = vsel %vm915_vm6, %v1374_v50, %v1376_v14  ;;  %v1380_v2 = vrot.slane %v5505_v10, 1  ;;  %v1388_v33 = vrot.slane %v5537_v55, 1 }
  0xf8   : > { %4711 = vmatprep.mubr.msk.bf16.mxu0 %vm454_vm3, %v2975_v9  ;;  %v3011_v9 = vsel %vm2868_vm7, %v3001_v54, %v3010_v3  ;;  %v3036_v38 = vrot.slane %v3034_v44, 3  ;;  %v3317_v54 = vrot.slane %v5560_v23, 3  ;;  %v3319_v23 = vrot.slane %v5573_v61, 3 }
  0xf9   : > { %v3019_v42 = vor.u32 %v3018_v1, %v3015_v60  ;;  %v1383_v61 = vsel %vm915_vm6, %v1380_v2, %v1382_v18  ;;  %v1768_v57 = vshrl.u32 %v5481_v34, 16 }
  0xfa   : > { %v3322_v60 = vsel %vm3315_vm8, %v3319_v23, %v3321_v17 }
  0xfb   : > { %v3020_v24 = vsel %vm2868_vm7, %v3010_v3, %v3019_v42  ;;  %v3029_v41 = vsel %vm2868_vm7, %v3019_v42, %v3028_v25  ;;  %v5127_v42 = vld [vmem:[%s5207_s25 + $0x98] ss:$0 sps:$4 sm:$0x11]   ;;  %v1770_v44 = vrot.slane %v1768_v57, 1 }
  0xfc   : > { %4544 = vmatmul.mubr.msk.bf16.gmra.mrb[4].mxu1 %vm454_vm3, %v1363_v15  ;;  %v1371_v15 = vsel %vm915_vm6, %v1368_v58, %v1370_v20  ;;  %v4158_v58 = vcombine.low %v3309_v59, %v5547_v46  ;;  %v3329_v59 = vrot.slane %v5617_v29, 3 }
  0xfd   : > { %4547 = vmatprep.mubr.msk.bf16.mxu1 %vm454_vm3, %v1365_v6  ;;  %v1373_v6 = vsel %vm915_vm6, %v1370_v20, %v1372_v48  ;;  %v3320_v20 = vsel %vm3315_vm8, %v3317_v54, %v3319_v23 }
  0xff   : > { %4712 = vmatmul.mubr.msk.bf16.gmra.mrb[20].mxu0 %vm454_vm3, %v2984_v63  ;;  %v3033_v63 = vrot.slane %v3031_v43, 2 }
 0x100   : > { %4715 = vmatprep.mubr.msk.bf16.mxu0 %vm454_vm3, %v2993_v27  ;;  %v1375_v27 = vsel %vm915_vm6, %v1372_v48, %v1374_v50  ;;  %v1386_v48 = vrot.slane %v5533_v39, 1  ;;  %v1780_v50 = vshll.u32 %v5500_v16, 16 }
 0x101   : > { %v3037_v11 = vor.u32 %v3036_v38, %v3033_v63  ;;  %v1789_v38 = vshll.u32 %v5505_v10, 16 }
 0x102   : > { %v1389_v43 = vsel %vm915_vm6, %v1386_v48, %v1388_v33 }
 0x103   : > { %v3038_v46 = vsel %vm2868_vm7, %v3028_v25, %v3037_v11 }
 0x104   : > { %4548 = vmatmul.mubr.msk.bf16.gmra.mrb[8].mxu1 %vm454_vm3, %v1367_v32  ;;  %v3316_v32 = vrot.slane %v4158_v58, 3  ;;  %v1782_v58 = vrot.slane %v1780_v50, 2 }
 0x105   : > { %4551 = vmatprep.mubr.msk.bf16.mxu1 %vm454_vm3, %v1369_v21  ;;  %v1378_v21 = vrot.slane %v5500_v16, 1 }
 0x106   : > { %v3318_v37 = vsel %vm3315_vm8, %v3316_v32, %v3317_v54  ;;  %v3333_v32 = vrot.slane %v5636_v13, 3  ;;  %v1795_v54 = vshrl.u32 %v5517_v28, 16 }
 0x107   : > { %4716 = vmatmul.mubr.msk.bf16.gmra.mrb[24].mxu0 %vm454_vm3, %v3002_v26  ;;  %v1379_v3 = vsel %vm915_vm6, %v1376_v14, %v1378_v21  ;;  %v1381_v40 = vsel %vm915_vm6, %v1378_v21, %v1380_v2  ;;  %v1384_v26 = vrot.slane %v5521_v31, 1  ;;  %v1798_v21 = vshll.u32 %v5517_v28, 16 }
 0x108   : > { %4719 = vmatprep.mubr.msk.bf16.mxu0 %vm454_vm3, %v3011_v9  ;;  %v3324_v9 = vsel %vm3315_vm8, %v3321_v17, %v3323_v30 }
 0x109   : > { %v1385_v1 = vsel %vm915_vm6, %v1382_v18, %v1384_v26  ;;  %v1387_v12 = vsel %vm915_vm6, %v1384_v26, %v1386_v48  ;;  %v1800_v23 = vrot.slane %v1798_v21, 2  ;;  %v1813_v26 = vshrl.u32 %v5533_v39, 16 }
 0x10b   : > { %v1815_v48 = vrot.slane %v1813_v26, 1 }
 0x10c   : > { %4552 = vmatmul.mubr.msk.bf16.gmra.mrb[12].mxu1 %vm454_vm3, %v1371_v15  ;;  %v1771_v15 = vshll.u32 %v5481_v34, 16  ;;  %v1390_v34 = vrot.slane %v5127_v42, 1  ;;  %v1834_v42 = vshll.u32 %v5553_v47, 16 }
 0x10d   : > { %4555 = vmatprep.mubr.msk.bf16.mxu1 %vm454_vm3, %v1373_v6  ;;  %v3327_v6 = vrot.slane %v5613_v35, 3  ;;  %v1786_v35 = vshrl.u32 %v5505_v10, 16 }
 0x10e   : > { %v1773_v25 = vrot.slane %v1771_v15, 2  ;;  %v1391_v29 = vsel %vm915_vm6, %v1388_v33, %v1390_v34  ;;  %v3339_v33 = vrot.slane %v5668_v4, 3 }
 0x10f   : > { %4720 = vmatmul.mubr.msk.bf16.gmra.mrb[28].mxu0 %vm454_vm3, %v3020_v24  ;;  %v3328_v24 = vsel %vm3315_vm8, %v3325_v52, %v3327_v6  ;;  %v3330_v14 = vsel %vm3315_vm8, %v3327_v6, %v3329_v59  ;;  %v1788_v11 = vrot.slane %v1786_v35, 1  ;;  %v3349_v35 = vrot.slane %v5709_v5, 3 }
 0x110   : > { %4723 = vmatprep.mubr.msk.bf16.mxu0 %vm454_vm3, %v3029_v41  ;;  %v1774_v63 = vor.u32 %v1773_v25, %v1770_v44  ;;  %v1779_v41 = vrot.slane %v1777_v49, 1  ;;  %v3345_v49 = vrot.slane %v5692_v53, 3 }
 0x112   : > { %v1775_v16 = vsel %vm1668_vm4, %v5396_v22, %v1774_v63  ;;  %v1783_v10 = vor.u32 %v1782_v58, %v1779_v41  ;;  %v1807_v22 = vshll.u32 %v5521_v31, 16 }
 0x114   : > { %4556 = vmatmul.mubr.msk.bf16.gmra.mrb[16].mxu1 %vm454_vm3, %v1375_v27  ;;  %v3331_v27 = vrot.slane %v5631_v8, 3  ;;  %v1804_v8 = vshrl.u32 %v5521_v31, 16  ;;  %v1784_v13 = vsel %vm1668_vm4, %v1774_v63, %v1783_v10  ;;  %v1809_v18 = vrot.slane %v1807_v22, 2 }
 0x115   : > { %4559 = vmatprep.mubr.msk.bf16.mxu1 %vm454_vm3, %v1377_v19  ;;  %v1791_v19 = vrot.slane %v1789_v38, 2 }
 0x116   : > { %v1806_v17 = vrot.slane %v1804_v8, 1 }
 0x117   : > { %4724 = vmatmul.mubr.msk.bf16.gmra.mrb[32].mxu0 %vm454_vm3, %v3038_v46  ;;  %v3332_v46 = vsel %vm3315_vm8, %v3329_v59, %v3331_v27  ;;  %v1792_v2 = vor.u32 %v1791_v19, %v1788_v11  ;;  %v3343_v59 = vrot.slane %v5687_v45, 3  ;;  %v3347_v45 = vrot.slane %v5705_v51, 3 }
 0x118   : > { %4729 = vmatprep.mubr.msk.bf16.mxu0 %vm454_vm3, %v3318_v37  ;;  %v3334_v37 = vsel %vm3315_vm8, %v3331_v27, %v3333_v32  ;;  %v1810_v30 = vor.u32 %v1809_v18, %v1806_v17 }
 0x119   : > { %v1793_v28 = vsel %vm1668_vm4, %v1783_v10, %v1792_v2  ;;  %v3348_v53 = vsel %vm3315_vm8, %v3345_v49, %v3347_v45  ;;  %v3350_v38 = vsel %vm3315_vm8, %v3347_v45, %v3349_v35 }
 0x11c   : > { %4560 = vmatmul.mubr.msk.bf16.gmra.mrb[20].mxu1 %vm454_vm3, %v1379_v3  ;;  %v1797_v3 = vrot.slane %v1795_v54, 1 }
 0x11d   : > { %4563 = vmatprep.mubr.msk.bf16.mxu1 %vm454_vm3, %v1381_v40  ;;  %v3335_v40 = vrot.slane %v5649_v62, 3  ;;  %v1822_v62 = vshrl.u32 %v5537_v55, 16 }
 0x11e   : > { %v1801_v31 = vor.u32 %v1800_v23, %v1797_v3 }
 0x11f   : > { %4730 = vmatmul.mubr.msk.bf16.vlgmr.msra.gmra.mrb[0].mxu0 %vm454_vm3, %v3320_v20  ;;  %v3337_v20 = vrot.slane %v5654_v0, 3  ;;  %v1824_v57 = vrot.slane %v1822_v62, 1 }
 0x120   : > { %4733 = vmatprep.mubr.msk.bf16.mxu0 %vm454_vm3, %v3322_v60  ;;  %v1816_v60 = vshll.u32 %v5533_v39, 16  ;;  %v1802_v0 = vsel %vm1668_vm4, %v1792_v2, %v1801_v31  ;;  %v1811_v39 = vsel %vm1668_vm4, %v1801_v31, %v1810_v30 }
 0x121   : > { %v3338_v52 = vsel %vm3315_vm8, %v3335_v40, %v3337_v20  ;;  %v3340_v6 = vsel %vm3315_vm8, %v3337_v20, %v3339_v33 }
 0x124   : > { %4564 = vmatmul.mubr.msk.bf16.gmra.mrb[24].mxu1 %vm454_vm3, %v1383_v61  ;;  %v3336_v61 = vsel %vm3315_vm8, %v3333_v32, %v3335_v40  ;;  %v6002_v40 = vld [vmem:[%s6134_s2] ss:$0 sm:$0xff] }
 0x125   : > { %4567 = vmatprep.mubr.msk.bf16.mxu1 %vm454_vm3, %v1385_v1  ;;  %v1825_v1 = vshll.u32 %v5537_v55, 16 }
 0x127   : > { %4734 = vmatmul.mubr.msk.bf16.gmra.mrb[4].mxu0 %vm454_vm3, %v3324_v9  ;;  %v1818_v9 = vrot.slane %v1816_v60, 2  ;;  %v1827_v15 = vrot.slane %v1825_v1, 2 }
 0x128   : > { %4737 = vmatprep.mubr.msk.bf16.mxu0 %vm454_vm3, %v3326_v7  ;;  %v3341_v7 = vrot.slane %v5674_v36, 3  ;;  %v1836_v36 = vrot.slane %v1834_v42, 2 }
 0x129   : > { %v1819_v55 = vor.u32 %v1818_v9, %v1815_v48 }
 0x12a   : > { %v3342_v4 = vsel %vm3315_vm8, %v3339_v33, %v3341_v7  ;;  %v3344_v50 = vsel %vm3315_vm8, %v3341_v7, %v3343_v59 }
 0x12b   : > { %v1820_v44 = vsel %vm1668_vm4, %v1810_v30, %v1819_v55 }
 0x12c   : > { %4568 = vmatmul.mubr.msk.bf16.gmra.mrb[28].mxu1 %vm454_vm3, %v1387_v12  ;;  %v1831_v12 = vshrl.u32 %v5553_v47, 16 }
 0x12d   : > { %4571 = vmatprep.mubr.msk.bf16.mxu1 %vm454_vm3, %v1389_v43  ;;  %v1828_v43 = vor.u32 %v1827_v15, %v1824_v57 }
 0x12e   : > { %v1833_v25 = vrot.slane %v1831_v12, 1 }
 0x12f   : > { %4738 = vmatmul.mubr.msk.bf16.gmra.mrb[8].mxu0 %vm454_vm3, %v3328_v24  ;;  %v1829_v34 = vsel %vm1668_vm4, %v1819_v55, %v1828_v43  ;;  %v3346_v24 = vsel %vm3315_vm8, %v3343_v59, %v3345_v49 }
 0x130   : > { %4741 = vmatprep.mubr.msk.bf16.mxu0 %vm454_vm3, %v3330_v14  ;;  %v1837_v47 = vor.u32 %v1836_v36, %v1833_v25  ;;  %v3351_v14 = vrot.slane %v5844_v56, 3 }
 0x132   : > { %v1838_v63 = vsel %vm1668_vm4, %v1828_v43, %v1837_v47 }
 0x134   : > { %4572 = vmatmul.mubr.msk.bf16.gmra.mrb[32].mxu1 %vm454_vm3, %v1391_v29  ;;  %v3352_v29 = vsel %vm3315_vm8, %v3349_v35, %v3351_v14 }
 0x135   : > { %4597 = vmatprep.mubr.msk.bf16.mxu1 %vm454_vm3, %v1775_v16 }
 0x137   : > { %4742 = vmatmul.mubr.msk.bf16.gmra.mrb[12].mxu0 %vm454_vm3, %v3332_v46 }
 0x138   : > { %4745 = vmatprep.mubr.msk.bf16.mxu0 %vm454_vm3, %v3334_v37 }
 0x13c   : > { %4598 = vmatmul.mubr.msk.bf16.vlgmr.msra.gmra.mrb[20].mxu1 %vm454_vm3, %v1784_v13 }
 0x13d   : > { %4601 = vmatprep.mubr.msk.bf16.mxu1 %vm454_vm3, %v1793_v28 }
 0x13f   : > { %4746 = vmatmul.mubr.msk.bf16.gmra.mrb[16].mxu0 %vm454_vm3, %v3336_v61 }
 0x140   : > { %4749 = vmatprep.mubr.msk.bf16.mxu0 %vm454_vm3, %v3338_v52 }
 0x144   : > { %4602 = vmatmul.mubr.msk.bf16.gmra.mrb[24].mxu1 %vm454_vm3, %v1802_v0 }
 0x145   : > { %4605 = vmatprep.mubr.msk.bf16.mxu1 %vm454_vm3, %v1811_v39 }
 0x147   : > { %4750 = vmatmul.mubr.msk.bf16.gmra.mrb[20].mxu0 %vm454_vm3, %v3340_v6 }
 0x148   : > { %4753 = vmatprep.mubr.msk.bf16.mxu0 %vm454_vm3, %v3342_v4 }
 0x14c   : > { %4606 = vmatmul.mubr.msk.bf16.gmra.mrb[28].mxu1 %vm454_vm3, %v1820_v44 }
 0x14d   : > { %4609 = vmatprep.mubr.msk.bf16.mxu1 %vm454_vm3, %v1829_v34 }
 0x14f   : > { %4754 = vmatmul.mubr.msk.bf16.gmra.mrb[24].mxu0 %vm454_vm3, %v3344_v50 }
 0x150   : > { %4757 = vmatprep.mubr.msk.bf16.mxu0 %vm454_vm3, %v3346_v24 }
 0x154   : > { %4610 = vmatmul.mubr.msk.bf16.gmra.mrb[32].mxu1 %vm454_vm3, %v1838_v63 }
 0x157   : > { %4758 = vmatmul.mubr.msk.bf16.gmra.mrb[28].mxu0 %vm454_vm3, %v3348_v53 }
 0x158   : > { %4761 = vmatprep.mubr.msk.bf16.mxu0 %vm454_vm3, %v3350_v38 }
 0x15f   : > { %4762 = vmatmul.mubr.msk.bf16.gmra.mrb[32].mxu0 %vm454_vm3, %v3352_v29 }
 0x1c7   : > { %v4541_v41 = vpop.f32.mrb[0].mxu1 }
 0x1c8   : > { %v1483_v51 = vpop.f32.mrb[1].mxu1 }
 0x1c9   : > { %v4542_v58 = vpop.f32.mrb[2].mxu1 }
 0x1ca   : > { %v1486_v5 = vpop.f32.mrb[3].mxu1 }
 0x1cf   : > { %v4545_v27 = vpop.f32.mrb[4].mxu1 }
 0x1d0   : > { %v1499_v16 = vpop.f32.mrb[5].mxu1 }
 0x1d1   : > { %v4546_v11 = vpop.f32.mrb[6].mxu1 }
 0x1d2   : > { %v1502_v19 = vpop.f32.mrb[7].mxu1 }
 0x1d7   : > { %v4549_v32 = vpop.f32.mrb[8].mxu1 }
 0x1d8   : > { %v5977_v10 = vpop.f32.mrb[9].mxu1 }
 0x1d9   : > { %v5979_v54 = vpop.f32.mrb[10].mxu1 }
 0x1da   : > { %v5981_v21 = vpop.f32.mrb[11].mxu1 }
 0x1df   : > { %v5983_v56 = vpop.f32.mrb[12].mxu1 }
 0x1e0   : > { %v5985_v46 = vpop.f32.mrb[13].mxu1 }
 0x1e1   : > { %v5987_v2 = vpop.f32.mrb[14].mxu1 }
 0x1e2   : > { %v5989_v8 = vpop.f32.mrb[15].mxu1 }
 0x1e7   : > { %v5991_v22 = vpop.f32.mrb[16].mxu1 }
 0x1e8   : > { %v5993_v37 = vpop.f32.mrb[17].mxu1 }
 0x1e9   : > { %v5995_v13 = vpop.f32.mrb[18].mxu1 }
 0x1ea   : > { %v5997_v3 = vpop.f32.mrb[19].mxu1 }
 0x1f2   : > { %v4731_v23 = vpop.f32.mrb[0].mxu0 }
 0x1f3   : > { %v4767_v28 = vadd.f32 %v4731_v23, %v4541_v41  ;;  %v3444_v17 = vpop.f32.mrb[1].mxu0 }
 0x1f4   : > { %v4768_v18 = vadd.f32 %v3444_v17, %v1483_v51  ;;  %v4732_v20 = vpop.f32.mrb[2].mxu0 }
 0x1f5   : > { %v3632_v31 = vadd.f32 %v4767_v28, %v6002_v40  ;;  %v4769_v26 = vadd.f32 %v4732_v20, %v4542_v58  ;;  %v3447_v60 = vpop.f32.mrb[3].mxu0 }
 0x1f6   : > { %v3630_v61 = vadd.f32 %v4768_v18, %v6002_v40  ;;  %v4770_v30 = vadd.f32 %v3447_v60, %v1486_v5 }
 0x1f7   : > { %v3668_v62 = vmax.f32 %v3632_v31, 0.0  ;;  %v3633_v1 = vadd.f32 %v4769_v26, %v6002_v40 }
 0x1f8   : > { %v3666_v52 = vmax.f32 %v3630_v61, 0.0  ;;  %v3631_v0 = vadd.f32 %v4770_v30, %v6002_v40 }
 0x1f9   : > { %v4218_v48 = vpack.c.bf16 %v3668_v62, %v3668_v62  ;;  %v3669_v9 = vmax.f32 %v3633_v1, 0.0 }
 0x1fa   : > { %v4216_v33 = vpack.c.bf16 %v3666_v52, %v3666_v52  ;;  %v3667_v39 = vmax.f32 %v3631_v0, 0.0  ;;  %v4735_v57 = vpop.f32.mrb[4].mxu0 }
 0x1fb   : > { %3849 = vst.msk [vmem:[%s6011_s16 + $0x8] sm:$0xf] %vm3846_vm9, %v4218_v48  ;;  %v4219_v15 = vpack.c.bf16 %v3669_v9, %v3669_v9  ;;  %v4771_v7 = vadd.f32 %v4735_v57, %v4545_v27  ;;  %v3460_v55 = vpop.f32.mrb[5].mxu0 }
 0x1fc   : > { %3847 = vst.msk [vmem:[%s6011_s16] sm:$0xf] %vm3846_vm9, %v4216_v33  ;;  %v4217_v12 = vpack.c.bf16 %v3667_v39, %v3667_v39  ;;  %v4772_v42 = vadd.f32 %v3460_v55, %v1499_v16  ;;  %v4736_v6 = vpop.f32.mrb[6].mxu0 }
 0x1fd   : > { %3850 = vst.msk [vmem:[%s6011_s16 + $0xc] sm:$0xf] %vm3846_vm9, %v4219_v15  ;;  %v3636_v43 = vadd.f32 %v4771_v7, %v6002_v40  ;;  %v4773_v4 = vadd.f32 %v4736_v6, %v4546_v11  ;;  %v3463_v44 = vpop.f32.mrb[7].mxu0 }
 0x1fe   : > { %3848 = vst.msk [vmem:[%s6011_s16 + $0x4] sm:$0xf] %vm3846_vm9, %v4217_v12  ;;  %v3634_v25 = vadd.f32 %v4772_v42, %v6002_v40  ;;  %v4774_v36 = vadd.f32 %v3463_v44, %v1502_v19 }
 0x1ff   : > { %v3672_v59 = vmax.f32 %v3636_v43, 0.0  ;;  %v3637_v34 = vadd.f32 %v4773_v4, %v6002_v40 }
 0x200   : > { %v3670_v49 = vmax.f32 %v3634_v25, 0.0  ;;  %v3635_v47 = vadd.f32 %v4774_v36, %v6002_v40 }
 0x201   : > { %v4222_v50 = vpack.c.bf16 %v3672_v59, %v3672_v59  ;;  %v3673_v24 = vmax.f32 %v3637_v34, 0.0 }
 0x202   : > { %v4220_v63 = vpack.c.bf16 %v3670_v49, %v3670_v49  ;;  %v3671_v45 = vmax.f32 %v3635_v47, 0.0  ;;  %v4739_v35 = vpop.f32.mrb[8].mxu0 }
 0x203   : > { %3853 = vst.msk [vmem:[%s6011_s16 + $0x18] sm:$0xf] %vm3846_vm9, %v4222_v50  ;;  %v4223_v53 = vpack.c.bf16 %v3673_v24, %v3673_v24  ;;  %v4775_v38 = vadd.f32 %v4739_v35, %v4549_v32  ;;  %v3476_v14 = vpop.f32.mrb[9].mxu0 }
 0x204   : > { %3851 = vst.msk [vmem:[%s6011_s16 + $0x10] sm:$0xf] %vm3846_vm9, %v4220_v63  ;;  %v4221_v29 = vpack.c.bf16 %v3671_v45, %v3671_v45  ;;  %v4776_v41 = vadd.f32 %v3476_v14, %v5977_v10  ;;  %v4740_v51 = vpop.f32.mrb[10].mxu0 }
 0x205   : > { %3854 = vst.msk [vmem:[%s6011_s16 + $0x1c] sm:$0xf] %vm3846_vm9, %v4223_v53  ;;  %v3640_v58 = vadd.f32 %v4775_v38, %v6002_v40  ;;  %v4777_v5 = vadd.f32 %v4740_v51, %v5979_v54  ;;  %v3479_v27 = vpop.f32.mrb[11].mxu0 }
 0x206   : > { %3852 = vst.msk [vmem:[%s6011_s16 + $0x14] sm:$0xf] %vm3846_vm9, %v4221_v29  ;;  %v3638_v16 = vadd.f32 %v4776_v41, %v6002_v40  ;;  %v4778_v11 = vadd.f32 %v3479_v27, %v5981_v21 }
 0x207   : > { %v3676_v19 = vmax.f32 %v3640_v58, 0.0  ;;  %v3641_v32 = vadd.f32 %v4777_v5, %v6002_v40 }
 0x208   : > { %v3674_v10 = vmax.f32 %v3638_v16, 0.0  ;;  %v3639_v23 = vadd.f32 %v4778_v11, %v6002_v40 }
 0x209   : > { %v4226_v28 = vpack.c.bf16 %v3676_v19, %v3676_v19  ;;  %v3677_v17 = vmax.f32 %v3641_v32, 0.0 }
 0x20a   : > { %v4224_v18 = vpack.c.bf16 %v3674_v10, %v3674_v10  ;;  %v3675_v54 = vmax.f32 %v3639_v23, 0.0  ;;  %v4743_v20 = vpop.f32.mrb[12].mxu0 }
 0x20b   : > { %3857 = vst.msk [vmem:[%s6011_s16 + $0x28] sm:$0xf] %vm3846_vm9, %v4226_v28  ;;  %v4227_v31 = vpack.c.bf16 %v3677_v17, %v3677_v17  ;;  %v4779_v26 = vadd.f32 %v4743_v20, %v5983_v56  ;;  %v3492_v60 = vpop.f32.mrb[13].mxu0 }
 0x20c   : > { %3855 = vst.msk [vmem:[%s6011_s16 + $0x20] sm:$0xf] %vm3846_vm9, %v4224_v18  ;;  %v4225_v21 = vpack.c.bf16 %v3675_v54, %v3675_v54  ;;  %v4780_v61 = vadd.f32 %v3492_v60, %v5985_v46  ;;  %v4744_v30 = vpop.f32.mrb[14].mxu0 }
 0x20d   : > { %3858 = vst.msk [vmem:[%s6011_s16 + $0x2c] sm:$0xf] %vm3846_vm9, %v4227_v31  ;;  %v3644_v62 = vadd.f32 %v4779_v26, %v6002_v40  ;;  %v4781_v1 = vadd.f32 %v4744_v30, %v5987_v2  ;;  %v3495_v52 = vpop.f32.mrb[15].mxu0 }
 0x20e   : > { %3856 = vst.msk [vmem:[%s6011_s16 + $0x24] sm:$0xf] %vm3846_vm9, %v4225_v21  ;;  %v3642_v56 = vadd.f32 %v4780_v61, %v6002_v40  ;;  %v4782_v48 = vadd.f32 %v3495_v52, %v5989_v8 }
 0x20f   : > { %v4599_v0 = vpop.f32.mrb[20].mxu1  ;;  %v3680_v33 = vmax.f32 %v3644_v62, 0.0  ;;  %v3645_v46 = vadd.f32 %v4781_v1, %v6002_v40 }
 0x210   : > { %v2010_v9 = vpop.f32.mrb[21].mxu1  ;;  %v3678_v57 = vmax.f32 %v3642_v56, 0.0  ;;  %v3643_v15 = vadd.f32 %v4782_v48, %v6002_v40 }
 0x211   : > { %v4600_v39 = vpop.f32.mrb[22].mxu1  ;;  %v4230_v7 = vpack.c.bf16 %v3680_v33, %v3680_v33  ;;  %v3681_v55 = vmax.f32 %v3645_v46, 0.0 }
 0x212   : > { %v2013_v2 = vpop.f32.mrb[23].mxu1  ;;  %v4228_v12 = vpack.c.bf16 %v3678_v57, %v3678_v57  ;;  %v3679_v42 = vmax.f32 %v3643_v15, 0.0  ;;  %v4747_v6 = vpop.f32.mrb[16].mxu0 }
 0x213   : > { %3861 = vst.msk [vmem:[%s6011_s16 + $0x38] sm:$0xf] %vm3846_vm9, %v4230_v7  ;;  %v4231_v8 = vpack.c.bf16 %v3681_v55, %v3681_v55  ;;  %v4783_v43 = vadd.f32 %v4747_v6, %v5991_v22  ;;  %v3508_v4 = vpop.f32.mrb[17].mxu0 }
 0x214   : > { %3859 = vst.msk [vmem:[%s6011_s16 + $0x30] sm:$0xf] %vm3846_vm9, %v4228_v12  ;;  %v4229_v44 = vpack.c.bf16 %v3679_v42, %v3679_v42  ;;  %v4784_v25 = vadd.f32 %v3508_v4, %v5993_v37  ;;  %v4748_v36 = vpop.f32.mrb[18].mxu0 }
 0x215   : > { %3862 = vst.msk [vmem:[%s6011_s16 + $0x3c] sm:$0xf] %vm3846_vm9, %v4231_v8  ;;  %v3648_v59 = vadd.f32 %v4783_v43, %v6002_v40  ;;  %v4785_v34 = vadd.f32 %v4748_v36, %v5995_v13  ;;  %v3511_v49 = vpop.f32.mrb[19].mxu0 }
 0x216   : > { %3860 = vst.msk [vmem:[%s6011_s16 + $0x34] sm:$0xf] %vm3846_vm9, %v4229_v44  ;;  %v3646_v22 = vadd.f32 %v4784_v25, %v6002_v40  ;;  %v4786_v50 = vadd.f32 %v3511_v49, %v5997_v3 }
 0x217   : > { %v4603_v47 = vpop.f32.mrb[24].mxu1  ;;  %v3684_v63 = vmax.f32 %v3648_v59, 0.0  ;;  %v3649_v37 = vadd.f32 %v4785_v34, %v6002_v40 }
 0x218   : > { %v2026_v24 = vpop.f32.mrb[25].mxu1  ;;  %v3682_v35 = vmax.f32 %v3646_v22, 0.0  ;;  %v3647_v53 = vadd.f32 %v4786_v50, %v6002_v40 }
 0x219   : > { %v4604_v45 = vpop.f32.mrb[26].mxu1  ;;  %v4234_v38 = vpack.c.bf16 %v3684_v63, %v3684_v63  ;;  %v3685_v14 = vmax.f32 %v3649_v37, 0.0 }
 0x21a   : > { %v2029_v13 = vpop.f32.mrb[27].mxu1  ;;  %v4232_v29 = vpack.c.bf16 %v3682_v35, %v3682_v35  ;;  %v3683_v41 = vmax.f32 %v3647_v53, 0.0  ;;  %v4751_v51 = vpop.f32.mrb[20].mxu0 }
 0x21b   : > { %3865 = vst.msk [vmem:[%s6011_s16 + $0x48] sm:$0xf] %vm3846_vm9, %v4234_v38  ;;  %v4235_v3 = vpack.c.bf16 %v3685_v14, %v3685_v14  ;;  %v4787_v58 = vadd.f32 %v4751_v51, %v4599_v0  ;;  %v3524_v5 = vpop.f32.mrb[21].mxu0 }
 0x21c   : > { %3863 = vst.msk [vmem:[%s6011_s16 + $0x40] sm:$0xf] %vm3846_vm9, %v4232_v29  ;;  %v4233_v27 = vpack.c.bf16 %v3683_v41, %v3683_v41  ;;  %v4788_v16 = vadd.f32 %v3524_v5, %v2010_v9  ;;  %v4752_v11 = vpop.f32.mrb[22].mxu0 }
 0x21d   : > { %3866 = vst.msk [vmem:[%s6011_s16 + $0x4c] sm:$0xf] %vm3846_vm9, %v4235_v3  ;;  %v3652_v19 = vadd.f32 %v4787_v58, %v6002_v40  ;;  %v4789_v32 = vadd.f32 %v4752_v11, %v4600_v39  ;;  %v3527_v10 = vpop.f32.mrb[23].mxu0 }
 0x21e   : > { %3864 = vst.msk [vmem:[%s6011_s16 + $0x44] sm:$0xf] %vm3846_vm9, %v4233_v27  ;;  %v3650_v28 = vadd.f32 %v4788_v16, %v6002_v40  ;;  %v4790_v17 = vadd.f32 %v3527_v10, %v2013_v2 }
 0x21f   : > { %v4607_v23 = vpop.f32.mrb[28].mxu1  ;;  %v3688_v54 = vmax.f32 %v3652_v19, 0.0  ;;  %v3653_v20 = vadd.f32 %v4789_v32, %v6002_v40 }
 0x220   : > { %v2042_v18 = vpop.f32.mrb[29].mxu1  ;;  %v3686_v26 = vmax.f32 %v3650_v28, 0.0  ;;  %v3651_v60 = vadd.f32 %v4790_v17, %v6002_v40 }
 0x221   : > { %v4608_v31 = vpop.f32.mrb[30].mxu1  ;;  %v4238_v61 = vpack.c.bf16 %v3688_v54, %v3688_v54  ;;  %v3689_v30 = vmax.f32 %v3653_v20, 0.0 }
 0x222   : > { %v2045_v21 = vpop.f32.mrb[31].mxu1  ;;  %v4236_v62 = vpack.c.bf16 %v3686_v26, %v3686_v26  ;;  %v3687_v1 = vmax.f32 %v3651_v60, 0.0  ;;  %v4755_v52 = vpop.f32.mrb[24].mxu0 }
 0x223   : > { %3869 = vst.msk [vmem:[%s6011_s16 + $0x58] sm:$0xf] %vm3846_vm9, %v4238_v61  ;;  %v4239_v0 = vpack.c.bf16 %v3689_v30, %v3689_v30  ;;  %v4791_v56 = vadd.f32 %v4755_v52, %v4603_v47  ;;  %v3540_v48 = vpop.f32.mrb[25].mxu0 }
 0x224   : > { %3867 = vst.msk [vmem:[%s6011_s16 + $0x50] sm:$0xf] %vm3846_vm9, %v4236_v62  ;;  %v4237_v9 = vpack.c.bf16 %v3687_v1, %v3687_v1  ;;  %v4792_v33 = vadd.f32 %v3540_v48, %v2026_v24  ;;  %v4756_v46 = vpop.f32.mrb[26].mxu0 }
 0x225   : > { %3870 = vst.msk [vmem:[%s6011_s16 + $0x5c] sm:$0xf] %vm3846_vm9, %v4239_v0  ;;  %v3656_v39 = vadd.f32 %v4791_v56, %v6002_v40  ;;  %v4793_v57 = vadd.f32 %v4756_v46, %v4604_v45  ;;  %v3543_v15 = vpop.f32.mrb[27].mxu0 }
 0x226   : > { %3868 = vst.msk [vmem:[%s6011_s16 + $0x54] sm:$0xf] %vm3846_vm9, %v4237_v9  ;;  %v3654_v7 = vadd.f32 %v4792_v33, %v6002_v40  ;;  %v4794_v55 = vadd.f32 %v3543_v15, %v2029_v13 }
 0x227   : > { %v4611_v2 = vpop.f32.mrb[32].mxu1  ;;  %v3692_v42 = vmax.f32 %v3656_v39, 0.0  ;;  %v3657_v6 = vadd.f32 %v4793_v57, %v6002_v40 }
 0x228   : > { %v2058_v12 = vpop.f32.mrb[33].mxu1  ;;  %v3690_v43 = vmax.f32 %v3654_v7, 0.0  ;;  %v3655_v4 = vadd.f32 %v4794_v55, %v6002_v40 }
 0x229   : > { %v4612_v8 = vpop.f32.mrb[34].mxu1  ;;  %v4242_v25 = vpack.c.bf16 %v3692_v42, %v3692_v42  ;;  %v3693_v36 = vmax.f32 %v3657_v6, 0.0 }
 0x22a   : > { %v2061_v44 = vpop.f32.mrb[35].mxu1  ;;  %v4240_v59 = vpack.c.bf16 %v3690_v43, %v3690_v43  ;;  %v3691_v34 = vmax.f32 %v3655_v4, 0.0  ;;  %v4759_v49 = vpop.f32.mrb[28].mxu0 }
 0x22b   : > { %3873 = vst.msk [vmem:[%s6011_s16 + $0x68] sm:$0xf] %vm3846_vm9, %v4242_v25  ;;  %v4243_v47 = vpack.c.bf16 %v3693_v36, %v3693_v36  ;;  %v4795_v22 = vadd.f32 %v4759_v49, %v4607_v23  ;;  %v3556_v50 = vpop.f32.mrb[29].mxu0 }
 0x22c   : > { %3871 = vst.msk [vmem:[%s6011_s16 + $0x60] sm:$0xf] %vm3846_vm9, %v4240_v59  ;;  %v4241_v24 = vpack.c.bf16 %v3691_v34, %v3691_v34  ;;  %v4796_v63 = vadd.f32 %v3556_v50, %v2042_v18  ;;  %v4760_v37 = vpop.f32.mrb[30].mxu0 }
 0x22d   : > { %3874 = vst.msk [vmem:[%s6011_s16 + $0x6c] sm:$0xf] %vm3846_vm9, %v4243_v47  ;;  %v3660_v45 = vadd.f32 %v4795_v22, %v6002_v40  ;;  %v4797_v35 = vadd.f32 %v4760_v37, %v4608_v31  ;;  %v3559_v53 = vpop.f32.mrb[31].mxu0 }
 0x22e   : > { %3872 = vst.msk [vmem:[%s6011_s16 + $0x64] sm:$0xf] %vm3846_vm9, %v4241_v24  ;;  %v3658_v13 = vadd.f32 %v4796_v63, %v6002_v40  ;;  %v4798_v38 = vadd.f32 %v3559_v53, %v2045_v21 }
 0x22f   : > { %v3696_v14 = vmax.f32 %v3660_v45, 0.0  ;;  %v3661_v29 = vadd.f32 %v4797_v35, %v6002_v40 }
 0x230   : > { %v3694_v41 = vmax.f32 %v3658_v13, 0.0  ;;  %v3659_v51 = vadd.f32 %v4798_v38, %v6002_v40 }
 0x231   : > { %v4246_v3 = vpack.c.bf16 %v3696_v14, %v3696_v14  ;;  %v3697_v58 = vmax.f32 %v3661_v29, 0.0 }
 0x232   : > { %v4244_v5 = vpack.c.bf16 %v3694_v41, %v3694_v41  ;;  %v3695_v27 = vmax.f32 %v3659_v51, 0.0  ;;  %v4763_v16 = vpop.f32.mrb[32].mxu0 }
 0x233   : > { %3877 = vst.msk [vmem:[%s6011_s16 + $0x78] sm:$0xf] %vm3846_vm9, %v4246_v3  ;;  %v4247_v11 = vpack.c.bf16 %v3697_v58, %v3697_v58  ;;  %v4799_v19 = vadd.f32 %v4763_v16, %v4611_v2  ;;  %v3572_v32 = vpop.f32.mrb[33].mxu0 }
 0x234   : > { %3875 = vst.msk [vmem:[%s6011_s16 + $0x70] sm:$0xf] %vm3846_vm9, %v4244_v5  ;;  %v4245_v10 = vpack.c.bf16 %v3695_v27, %v3695_v27  ;;  %v4800_v23 = vadd.f32 %v3572_v32, %v2058_v12  ;;  %v4764_v28 = vpop.f32.mrb[34].mxu0 }
 0x235   : > { %3878 = vst.msk [vmem:[%s6011_s16 + $0x7c] sm:$0xf] %vm3846_vm9, %v4247_v11  ;;  %v3664_v17 = vadd.f32 %v4799_v19, %v6002_v40  ;;  %v4801_v18 = vadd.f32 %v4764_v28, %v4612_v8  ;;  %v3575_v54 = vpop.f32.mrb[35].mxu0 }
 0x236   : > { %3876 = vst.msk [vmem:[%s6011_s16 + $0x74] sm:$0xf] %vm3846_vm9, %v4245_v10  ;;  %v3662_v20 = vadd.f32 %v4800_v23, %v6002_v40  ;;  %v4802_v31 = vadd.f32 %v3575_v54, %v2061_v44 }
 0x237   : > { %v3700_v26 = vmax.f32 %v3664_v17, 0.0  ;;  %v3665_v60 = vadd.f32 %v4801_v18, %v6002_v40 }
 0x238   : > { %v3698_v21 = vmax.f32 %v3662_v20, 0.0  ;;  %v3663_v61 = vadd.f32 %v4802_v31, %v6002_v40 }
 0x239   : > { %v4250_v30 = vpack.c.bf16 %v3700_v26, %v3700_v26  ;;  %v3701_v62 = vmax.f32 %v3665_v60, 0.0 }
 0x23a   : > { %v4248_v1 = vpack.c.bf16 %v3698_v21, %v3698_v21  ;;  %v3699_v52 = vmax.f32 %v3663_v61, 0.0 }
 0x23b   : > { %3881 = vst.msk [vmem:[%s6011_s16 + $0x88] sm:$0xf] %vm3846_vm9, %v4250_v30  ;;  %v4251_v0 = vpack.c.bf16 %v3701_v62, %v3701_v62 }
 0x23c   : > { %3879 = vst.msk [vmem:[%s6011_s16 + $0x80] sm:$0xf] %vm3846_vm9, %v4248_v1  ;;  %v4249_v56 = vpack.c.bf16 %v3699_v52, %v3699_v52 }
 0x23d   : > { %3882 = vst.msk [vmem:[%s6011_s16 + $0x8c] sm:$0xf] %vm3846_vm9, %v4251_v0 }
 0x23e   : > { %3880 = vst.msk [vmem:[%s6011_s16 + $0x84] sm:$0xf] %vm3846_vm9, %v4249_v56 }
 0x23f PF: > { %s13_s12 = sadd.s32 1, %s5144_s12  }
 0x240   : > { %p10_p4 = scmp.ge.s32.totalorder %s13_s12, 6  }
 0x242   :  { %12 = sbr.rel (!%p10_p4) target bundleno = 1 (0x1), region = 70 }

</bundles_post_ra>
